<compile_context>
chip_gen: v5e
topology: v5e:2x2
jax: 0.10.0
libtpu: 0.0.40
codegen_flags: <defaults>
</compile_context>

<pallas_src>
from functools import partial

import jax
import jax.numpy as jnp
from jax.experimental import pallas as pl
from jax.experimental.pallas import tpu as pltpu

LANE = 128      # TPU lane width: all feature dims padded to this
SUBLANE = 8     # sublane granularity: graph-count padded to this


def _vmem_spec():
    return pl.BlockSpec(memory_space=pltpu.MemorySpace.VMEM)


def _pad2(a, rows, cols):
    return jnp.pad(a, ((0, rows - a.shape[0]), (0, cols - a.shape[1])))


# ----------------------------- fused Pallas kernel --------------------------

def gin_fused_kernel(a_ref, x_ref, w1_ref, b1_ref, w2_ref, b2_ref, p_ref,
                     wa_ref, ba_ref, wb_ref, bb_ref, wc_ref, bc_ref,
                     o_ref, h_ref, *, num_layers, eps):
    """Whole GIN forward: all GINConv layers + sum-pool + MLP readout head.

    All dot operands are bf16 (A, node state, weights); accumulation is f32 via
    preferred_element_type. Biases (f32) are added to the f32 accumulator.
    """
    # Node state h lives in a bf16 VMEM scratch across the layer loop.
    h_ref[...] = x_ref[...]

    for l in range(num_layers):        # static unroll; num_layers is small
        h = h_ref[...]                                         # bf16 (Np, 128)
        # neighbor sum-aggregation: bf16 x bf16 MXU matmul, f32 accumulate
        agg = jnp.dot(a_ref[...], h, preferred_element_type=jnp.float32)
        if eps != 0.0:                 # eps is static -> no vmul when eps == 0
            hh = (1.0 + eps) * h.astype(jnp.float32) + agg
        else:
            hh = h.astype(jnp.float32) + agg
        # Linear1 (eval-BN pre-folded into w1/b1 on host) + ReLU
        z = jnp.dot(hh.astype(jnp.bfloat16), w1_ref[l],
                    preferred_element_type=jnp.float32) + b1_ref[l]
        z = jnp.maximum(z, 0.0)
        # Linear2 + ReLU (the trailing F.relu in GIN.forward is idempotent here)
        y = jnp.dot(z.astype(jnp.bfloat16), w2_ref[l],
                    preferred_element_type=jnp.float32) + b2_ref[l]
        h_ref[...] = jnp.maximum(y, 0.0).astype(jnp.bfloat16)

    # global_add_pool (P @ h) fused with the MLP readout head
    pooled = jnp.dot(p_ref[...], h_ref[...], preferred_element_type=jnp.float32)
    y = jnp.dot(pooled.astype(jnp.bfloat16), wa_ref[...],
                preferred_element_type=jnp.float32) + ba_ref[...]
    y = jnp.maximum(y, 0.0)
    y = jnp.dot(y.astype(jnp.bfloat16), wb_ref[...],
                preferred_element_type=jnp.float32) + bb_ref[...]
    y = jnp.maximum(y, 0.0)
    o_ref[...] = jnp.dot(y.astype(jnp.bfloat16), wc_ref[...],
                         preferred_element_type=jnp.float32) + bc_ref[...]


# ----------------------------- wrapper ---------------------------------------

def _stack_layer_params(layer_params):
    """Fold eval-BN into Linear1, zero-pad to 128 lanes, bf16 weights, stack."""
    W1, B1, W2, B2 = [], [], [], []
    for (w1, b1, sc, sh, w2, b2) in layer_params:
        w1f = w1 * sc                  # per-output-column scale
        b1f = b1 * sc + sh
        W1.append(_pad2(w1f, LANE, LANE).astype(jnp.bfloat16))
        B1.append(_pad2(b1f, 1, LANE))                       # f32
        W2.append(_pad2(w2, LANE, LANE).astype(jnp.bfloat16))
        B2.append(_pad2(b2, 1, LANE))                        # f32
    return jnp.stack(W1), jnp.stack(B1), jnp.stack(W2), jnp.stack(B2)


def _pad_head_params(head_params):
    wa, ba, wb, bb, wc, bc = head_params
    return (_pad2(wa, LANE, LANE).astype(jnp.bfloat16), _pad2(ba, 1, LANE),
            _pad2(wb, LANE, LANE).astype(jnp.bfloat16), _pad2(bb, 1, LANE),
            _pad2(wc, LANE, LANE).astype(jnp.bfloat16), _pad2(bc, 1, LANE))


def gin_forward(x, A, P, layer_params, head_params, eps=0.0):
    N = x.shape[0]
    G = P.shape[0]
    n_classes = head_params[4].shape[1]             # wc: (out_dim//4, 4)
    num_layers = len(layer_params)

    # Pad nodes so A / P last dims are lane-dense; pad graphs to sublane mult.
    Np = ((N + LANE - 1) // LANE) * LANE
    Gp = ((G + SUBLANE - 1) // SUBLANE) * SUBLANE

    x_p = _pad2(x, Np, LANE).astype(jnp.bfloat16)
    # bf16 A is exact for small integer edge multiplicities (<= 256).
    A_p = _pad2(A, Np, Np).astype(jnp.bfloat16)
    P_p = _pad2(P, Gp, Np).astype(jnp.bfloat16)     # 0/1 entries: exact in bf16
    W1, B1, W2, B2 = _stack_layer_params(layer_params)
    head = _pad_head_params(head_params)

    vmem = _vmem_spec()
    out = pl.pallas_call(
        partial(gin_fused_kernel, num_layers=num_layers, eps=eps),
        out_shape=jax.ShapeDtypeStruct((Gp, LANE), jnp.float32),
        in_specs=[vmem] * 13,
        out_specs=vmem,
        scratch_shapes=[pltpu.VMEM((Np, LANE), jnp.bfloat16)],
        compiler_params=pltpu.CompilerParams(
            vmem_limit_bytes=48 * 1024 * 1024),
    )(A_p, x_p, W1, B1, W2, B2, P_p, *head)
    return out[:G, :n_classes]


# --------------------- deterministic parameter setup ------------------------

def init_linear(key, fan_in, fan_out):
    """PyTorch-style Linear init; weights stored (in, out) for x @ W."""
    kw, kb = jax.random.split(key)
    lim = 1.0 / jnp.sqrt(jnp.float32(fan_in))
    w = jax.random.uniform(kw, (fan_in, fan_out), jnp.float32, -lim, lim)
    b = jax.random.uniform(kb, (1, fan_out), jnp.float32, -lim, lim)
    return w, b


def init_gin_params(key, num_input_features, num_layers, hidden_dim, out_dim):
    dims = [(num_input_features, hidden_dim, hidden_dim)]
    dims += [(hidden_dim, hidden_dim, hidden_dim)] * (num_layers - 2)
    dims += [(hidden_dim, hidden_dim, out_dim)]
    layer_params = []
    for (d_in, d_hid, d_out) in dims:
        key, k1, k2 = jax.random.split(key, 3)
        w1, b1 = init_linear(k1, d_in, d_hid)
        w2, b2 = init_linear(k2, d_hid, d_out)
        # BatchNorm1d at default init, eval mode: gamma=1, beta=0, mean=0, var=1
        gamma = jnp.ones((1, d_hid), jnp.float32)
        beta = jnp.zeros((1, d_hid), jnp.float32)
        rmean = jnp.zeros((1, d_hid), jnp.float32)
        rvar = jnp.ones((1, d_hid), jnp.float32)
        scale = gamma / jnp.sqrt(rvar + 1e-5)
        shift = beta - rmean * scale
        layer_params.append((w1, b1, scale, shift, w2, b2))

    # MLPReadout(out_dim, 4, L=2): out_dim -> out_dim//2 -> out_dim//4 -> 4
    key, ka, kb, kc = jax.random.split(key, 4)
    wa, ba = init_linear(ka, out_dim, out_dim // 2)
    wb, bb = init_linear(kb, out_dim // 2, out_dim // 4)
    wc, bc = init_linear(kc, out_dim // 4, 4)
    head_params = (wa, ba, wb, bb, wc, bc)
    return layer_params, head_params


# ----------------------------- references ------------------------------------

def ref_forward_f32(x, A, P, layer_params, head_params):
    """Pure f32 reference (module semantics, eval mode)."""
    h = x
    for (w1, b1, sc, sh, w2, b2) in layer_params:
        hh = h + A @ h
        z = jnp.maximum((hh @ w1 + b1) * sc + sh, 0.0)
        h = jnp.maximum(z @ w2 + b2, 0.0)
    pooled = P @ h
    wa, ba, wb, bb, wc, bc = head_params
    y = jnp.maximum(pooled @ wa + ba, 0.0)
    y = jnp.maximum(y @ wb + bb, 0.0)
    return y @ wc + bc


def ref_forward_bf16(x, A, P, layer_params, head_params):
    """Plain-JAX reference emulating the kernel's exact bf16-in / f32-acc path."""
    bf = jnp.bfloat16
    f32 = jnp.float32
    h = x.astype(bf)
    Ab = A.astype(bf)
    for (w1, b1, sc, sh, w2, b2) in layer_params:
        w1f = (w1 * sc).astype(bf)
        b1f = b1 * sc + sh
        agg = jnp.dot(Ab, h, preferred_element_type=f32)
        hh = h.astype(f32) + agg
        z = jnp.maximum(jnp.dot(hh.astype(bf), w1f, preferred_element_type=f32)
                        + b1f, 0.0)
        y = jnp.maximum(jnp.dot(z.astype(bf), w2.astype(bf),
                                preferred_element_type=f32) + b2, 0.0)
        h = y.astype(bf)
    pooled = jnp.dot(P.astype(bf), h, preferred_element_type=f32)
    wa, ba, wb, bb, wc, bc = head_params
    y = jnp.maximum(jnp.dot(pooled.astype(bf), wa.astype(bf),
                            preferred_element_type=f32) + ba, 0.0)
    y = jnp.maximum(jnp.dot(y.astype(bf), wb.astype(bf),
                            preferred_element_type=f32) + bb, 0.0)
    return jnp.dot(y.astype(bf), wc.astype(bf), preferred_element_type=f32) + bc


# ----------------------------- main ------------------------------------------

if __name__ == "__main__":
    key = jax.random.PRNGKey(0)

    # small graph-batch consistent with the module's forward signature
    num_nodes = 32
    num_edges = 64
    num_input_features = 8
    num_layers = 3
    hidden_dim = 32
    out_dim = 16
    num_graphs = 2

    key, kx, ke, kp = jax.random.split(key, 4)
    x = jax.random.normal(kx, (num_nodes, num_input_features), jnp.float32)
    edge_index = jax.random.randint(ke, (2, num_edges), 0, num_nodes,
                                    dtype=jnp.int32)
    batch = jnp.concatenate([
        jnp.zeros((num_nodes // 2,), jnp.int32),
        jnp.ones((num_nodes - num_nodes // 2,), jnp.int32),
    ])

    # densify graph structure (plain-JAX glue): A[dst, src] += 1 ; P[g, n]
    A = jnp.zeros((num_nodes, num_nodes), jnp.float32).at[
        edge_index[1], edge_index[0]].add(1.0)
    P = (batch[None, :] == jnp.arange(num_graphs)[:, None]).astype(jnp.float32)

    # bf16 storage of A is exact only for edge multiplicities <= 256.
    assert float(jnp.max(A)) <= 256.0

    layer_params, head_params = init_gin_params(
        kp, num_input_features, num_layers, hidden_dim, out_dim)

    gin_fwd = jax.jit(gin_forward)
    pred = gin_fwd(x, A, P, layer_params, head_params)
    pred = jax.block_until_ready(pred)
    assert pred.shape == (num_graphs, 4)

    # Strict check vs. a plain-JAX reference doing the same bf16-in/f32-acc math.
    ref_bf16 = ref_forward_bf16(x, A, P, layer_params, head_params)
    assert jnp.allclose(pred, ref_bf16, atol=1e-4, rtol=1e-4)

    # Sanity check vs. the full-f32 module semantics (loose: bf16 matmul inputs).
    ref_f32 = ref_forward_f32(x, A, P, layer_params, head_params)
    assert jnp.allclose(pred, ref_f32, atol=1.5e-1, rtol=1.5e-1)

    print("KERNEL_OK")
</pallas_src>

<mosaic_0001>
module attributes {stable_mosaic.version = 11 : i64} {
  func.func @gin_fused_kernel(%arg0: memref<128x128xbf16, #tpu.memory_space<vmem>>, %arg1: memref<128x128xbf16, #tpu.memory_space<vmem>>, %arg2: memref<3x128x128xbf16, #tpu.memory_space<vmem>>, %arg3: memref<3x1x128xf32, #tpu.memory_space<vmem>>, %arg4: memref<3x128x128xbf16, #tpu.memory_space<vmem>>, %arg5: memref<3x1x128xf32, #tpu.memory_space<vmem>>, %arg6: memref<8x128xbf16, #tpu.memory_space<vmem>>, %arg7: memref<128x128xbf16, #tpu.memory_space<vmem>>, %arg8: memref<1x128xf32, #tpu.memory_space<vmem>>, %arg9: memref<128x128xbf16, #tpu.memory_space<vmem>>, %arg10: memref<1x128xf32, #tpu.memory_space<vmem>>, %arg11: memref<128x128xbf16, #tpu.memory_space<vmem>>, %arg12: memref<1x128xf32, #tpu.memory_space<vmem>>, %arg13: memref<8x128xf32, #tpu.memory_space<vmem>>, %arg14: memref<128x128xbf16, #tpu.memory_space<vmem>>) attributes {dimension_semantics = [], scalar_prefetch = 0 : i64, scratch_operands = 1 : i64, tpu.core_type = #tpu.core_type<tc>} {
    %c0 = arith.constant 0 : index
    %c0_0 = arith.constant 0 : index
    %0 = vector.load %arg1[%c0, %c0_0] : memref<128x128xbf16, #tpu.memory_space<vmem>>, vector<128x128xbf16>
    %c0_1 = arith.constant 0 : index
    %c0_2 = arith.constant 0 : index
    %1 = vector.load %arg14[%c0_1, %c0_2] : memref<128x128xbf16, #tpu.memory_space<vmem>>, vector<128x128xbf16>
    tpu.vector_store %arg14[%c0_1, %c0_2], %0 {strides = array<i32>} : memref<128x128xbf16, #tpu.memory_space<vmem>>, vector<128x128xbf16>,
    %c0_3 = arith.constant 0 : index
    %c0_4 = arith.constant 0 : index
    %2 = vector.load %arg14[%c0_3, %c0_4] : memref<128x128xbf16, #tpu.memory_space<vmem>>, vector<128x128xbf16>
    %c0_5 = arith.constant 0 : index
    %c0_6 = arith.constant 0 : index
    %3 = vector.load %arg0[%c0_5, %c0_6] : memref<128x128xbf16, #tpu.memory_space<vmem>>, vector<128x128xbf16>
    %cst = arith.constant dense<0.000000e+00> : vector<128x128xf32>
    %4 = tpu.matmul %3, %2, %cst {dimension_numbers = #tpu.dot_dimension_numbers<[1], [0], [0], [1], [0, 0, 1, 1], [], []>} : vector<128x128xbf16>, vector<128x128xbf16>, vector<128x128xf32> -> vector<128x128xf32>
    %5 = arith.extf %2 : vector<128x128xbf16> to vector<128x128xf32>
    %6 = arith.addf %5, %4 : vector<128x128xf32>
    %7 = arith.truncf %6 : vector<128x128xf32> to vector<128x128xbf16>
    %c0_7 = arith.constant 0 : index
    %c0_8 = arith.constant 0 : index
    %c0_9 = arith.constant 0 : index
    %8 = vector.load %arg2[%c0_7, %c0_8, %c0_9] : memref<3x128x128xbf16, #tpu.memory_space<vmem>>, vector<1x128x128xbf16>
    %9 = vector.shape_cast %8 : vector<1x128x128xbf16> to vector<128x128xbf16>
    %cst_10 = arith.constant dense<0.000000e+00> : vector<128x128xf32>
    %10 = tpu.matmul %7, %9, %cst_10 {dimension_numbers = #tpu.dot_dimension_numbers<[1], [0], [0], [1], [0, 0, 1, 1], [], []>} : vector<128x128xbf16>, vector<128x128xbf16>, vector<128x128xf32> -> vector<128x128xf32>
    %c0_11 = arith.constant 0 : index
    %c0_12 = arith.constant 0 : index
    %c0_13 = arith.constant 0 : index
    %11 = vector.load %arg3[%c0_11, %c0_12, %c0_13] : memref<3x1x128xf32, #tpu.memory_space<vmem>>, vector<1x1x128xf32>
    %12 = vector.shape_cast %11 : vector<1x1x128xf32> to vector<1x128xf32>
    %13 = vector.broadcast %12 : vector<1x128xf32> to vector<128x128xf32>
    %14 = arith.addf %10, %13 : vector<128x128xf32>
    %cst_14 = arith.constant 0.000000e+00 : f32
    %15 = vector.broadcast %cst_14 : f32 to vector<128x128xf32>
    %16 = arith.maximumf %14, %15 : vector<128x128xf32>
    %17 = arith.truncf %16 : vector<128x128xf32> to vector<128x128xbf16>
    %c0_15 = arith.constant 0 : index
    %c0_16 = arith.constant 0 : index
    %c0_17 = arith.constant 0 : index
    %18 = vector.load %arg4[%c0_15, %c0_16, %c0_17] : memref<3x128x128xbf16, #tpu.memory_space<vmem>>, vector<1x128x128xbf16>
    %19 = vector.shape_cast %18 : vector<1x128x128xbf16> to vector<128x128xbf16>
    %cst_18 = arith.constant dense<0.000000e+00> : vector<128x128xf32>
    %20 = tpu.matmul %17, %19, %cst_18 {dimension_numbers = #tpu.dot_dimension_numbers<[1], [0], [0], [1], [0, 0, 1, 1], [], []>} : vector<128x128xbf16>, vector<128x128xbf16>, vector<128x128xf32> -> vector<128x128xf32>
    %c0_19 = arith.constant 0 : index
    %c0_20 = arith.constant 0 : index
    %c0_21 = arith.constant 0 : index
    %21 = vector.load %arg5[%c0_19, %c0_20, %c0_21] : memref<3x1x128xf32, #tpu.memory_space<vmem>>, vector<1x1x128xf32>
    %22 = vector.shape_cast %21 : vector<1x1x128xf32> to vector<1x128xf32>
    %23 = vector.broadcast %22 : vector<1x128xf32> to vector<128x128xf32>
    %24 = arith.addf %20, %23 : vector<128x128xf32>
    %cst_22 = arith.constant 0.000000e+00 : f32
    %25 = vector.broadcast %cst_22 : f32 to vector<128x128xf32>
    %26 = arith.maximumf %24, %25 : vector<128x128xf32>
    %27 = arith.truncf %26 : vector<128x128xf32> to vector<128x128xbf16>
    %c0_23 = arith.constant 0 : index
    %c0_24 = arith.constant 0 : index
    %28 = vector.load %arg14[%c0_23, %c0_24] : memref<128x128xbf16, #tpu.memory_space<vmem>>, vector<128x128xbf16>
    tpu.vector_store %arg14[%c0_23, %c0_24], %27 {strides = array<i32>} : memref<128x128xbf16, #tpu.memory_space<vmem>>, vector<128x128xbf16>,
    %c0_25 = arith.constant 0 : index
    %c0_26 = arith.constant 0 : index
    %29 = vector.load %arg14[%c0_25, %c0_26] : memref<128x128xbf16, #tpu.memory_space<vmem>>, vector<128x128xbf16>
    %c0_27 = arith.constant 0 : index
    %c0_28 = arith.constant 0 : index
    %30 = vector.load %arg0[%c0_27, %c0_28] : memref<128x128xbf16, #tpu.memory_space<vmem>>, vector<128x128xbf16>
    %cst_29 = arith.constant dense<0.000000e+00> : vector<128x128xf32>
    %31 = tpu.matmul %30, %29, %cst_29 {dimension_numbers = #tpu.dot_dimension_numbers<[1], [0], [0], [1], [0, 0, 1, 1], [], []>} : vector<128x128xbf16>, vector<128x128xbf16>, vector<128x128xf32> -> vector<128x128xf32>
    %32 = arith.extf %29 : vector<128x128xbf16> to vector<128x128xf32>
    %33 = arith.addf %32, %31 : vector<128x128xf32>
    %34 = arith.truncf %33 : vector<128x128xf32> to vector<128x128xbf16>
    %c1 = arith.constant 1 : index
    %c0_30 = arith.constant 0 : index
    %c0_31 = arith.constant 0 : index
    %35 = vector.load %arg2[%c1, %c0_30, %c0_31] : memref<3x128x128xbf16, #tpu.memory_space<vmem>>, vector<1x128x128xbf16>
    %36 = vector.shape_cast %35 : vector<1x128x128xbf16> to vector<128x128xbf16>
    %cst_32 = arith.constant dense<0.000000e+00> : vector<128x128xf32>
    %37 = tpu.matmul %34, %36, %cst_32 {dimension_numbers = #tpu.dot_dimension_numbers<[1], [0], [0], [1], [0, 0, 1, 1], [], []>} : vector<128x128xbf16>, vector<128x128xbf16>, vector<128x128xf32> -> vector<128x128xf32>
    %c1_33 = arith.constant 1 : index
    %c0_34 = arith.constant 0 : index
    %c0_35 = arith.constant 0 : index
    %38 = vector.load %arg3[%c1_33, %c0_34, %c0_35] : memref<3x1x128xf32, #tpu.memory_space<vmem>>, vector<1x1x128xf32>
    %39 = vector.shape_cast %38 : vector<1x1x128xf32> to vector<1x128xf32>
    %40 = vector.broadcast %39 : vector<1x128xf32> to vector<128x128xf32>
    %41 = arith.addf %37, %40 : vector<128x128xf32>
    %cst_36 = arith.constant 0.000000e+00 : f32
    %42 = vector.broadcast %cst_36 : f32 to vector<128x128xf32>
    %43 = arith.maximumf %41, %42 : vector<128x128xf32>
    %44 = arith.truncf %43 : vector<128x128xf32> to vector<128x128xbf16>
    %c1_37 = arith.constant 1 : index
    %c0_38 = arith.constant 0 : index
    %c0_39 = arith.constant 0 : index
    %45 = vector.load %arg4[%c1_37, %c0_38, %c0_39] : memref<3x128x128xbf16, #tpu.memory_space<vmem>>, vector<1x128x128xbf16>
    %46 = vector.shape_cast %45 : vector<1x128x128xbf16> to vector<128x128xbf16>
    %cst_40 = arith.constant dense<0.000000e+00> : vector<128x128xf32>
    %47 = tpu.matmul %44, %46, %cst_40 {dimension_numbers = #tpu.dot_dimension_numbers<[1], [0], [0], [1], [0, 0, 1, 1], [], []>} : vector<128x128xbf16>, vector<128x128xbf16>, vector<128x128xf32> -> vector<128x128xf32>
    %c1_41 = arith.constant 1 : index
    %c0_42 = arith.constant 0 : index
    %c0_43 = arith.constant 0 : index
    %48 = vector.load %arg5[%c1_41, %c0_42, %c0_43] : memref<3x1x128xf32, #tpu.memory_space<vmem>>, vector<1x1x128xf32>
    %49 = vector.shape_cast %48 : vector<1x1x128xf32> to vector<1x128xf32>
    %50 = vector.broadcast %49 : vector<1x128xf32> to vector<128x128xf32>
    %51 = arith.addf %47, %50 : vector<128x128xf32>
    %cst_44 = arith.constant 0.000000e+00 : f32
    %52 = vector.broadcast %cst_44 : f32 to vector<128x128xf32>
    %53 = arith.maximumf %51, %52 : vector<128x128xf32>
    %54 = arith.truncf %53 : vector<128x128xf32> to vector<128x128xbf16>
    %c0_45 = arith.constant 0 : index
    %c0_46 = arith.constant 0 : index
    %55 = vector.load %arg14[%c0_45, %c0_46] : memref<128x128xbf16, #tpu.memory_space<vmem>>, vector<128x128xbf16>
    tpu.vector_store %arg14[%c0_45, %c0_46], %54 {strides = array<i32>} : memref<128x128xbf16, #tpu.memory_space<vmem>>, vector<128x128xbf16>,
    %c0_47 = arith.constant 0 : index
    %c0_48 = arith.constant 0 : index
    %56 = vector.load %arg14[%c0_47, %c0_48] : memref<128x128xbf16, #tpu.memory_space<vmem>>, vector<128x128xbf16>
    %c0_49 = arith.constant 0 : index
    %c0_50 = arith.constant 0 : index
    %57 = vector.load %arg0[%c0_49, %c0_50] : memref<128x128xbf16, #tpu.memory_space<vmem>>, vector<128x128xbf16>
    %cst_51 = arith.constant dense<0.000000e+00> : vector<128x128xf32>
    %58 = tpu.matmul %57, %56, %cst_51 {dimension_numbers = #tpu.dot_dimension_numbers<[1], [0], [0], [1], [0, 0, 1, 1], [], []>} : vector<128x128xbf16>, vector<128x128xbf16>, vector<128x128xf32> -> vector<128x128xf32>
    %59 = arith.extf %56 : vector<128x128xbf16> to vector<128x128xf32>
    %60 = arith.addf %59, %58 : vector<128x128xf32>
    %61 = arith.truncf %60 : vector<128x128xf32> to vector<128x128xbf16>
    %c2 = arith.constant 2 : index
    %c0_52 = arith.constant 0 : index
    %c0_53 = arith.constant 0 : index
    %62 = vector.load %arg2[%c2, %c0_52, %c0_53] : memref<3x128x128xbf16, #tpu.memory_space<vmem>>, vector<1x128x128xbf16>
    %63 = vector.shape_cast %62 : vector<1x128x128xbf16> to vector<128x128xbf16>
    %cst_54 = arith.constant dense<0.000000e+00> : vector<128x128xf32>
    %64 = tpu.matmul %61, %63, %cst_54 {dimension_numbers = #tpu.dot_dimension_numbers<[1], [0], [0], [1], [0, 0, 1, 1], [], []>} : vector<128x128xbf16>, vector<128x128xbf16>, vector<128x128xf32> -> vector<128x128xf32>
    %c2_55 = arith.constant 2 : index
    %c0_56 = arith.constant 0 : index
    %c0_57 = arith.constant 0 : index
    %65 = vector.load %arg3[%c2_55, %c0_56, %c0_57] : memref<3x1x128xf32, #tpu.memory_space<vmem>>, vector<1x1x128xf32>
    %66 = vector.shape_cast %65 : vector<1x1x128xf32> to vector<1x128xf32>
    %67 = vector.broadcast %66 : vector<1x128xf32> to vector<128x128xf32>
    %68 = arith.addf %64, %67 : vector<128x128xf32>
    %cst_58 = arith.constant 0.000000e+00 : f32
    %69 = vector.broadcast %cst_58 : f32 to vector<128x128xf32>
    %70 = arith.maximumf %68, %69 : vector<128x128xf32>
    %71 = arith.truncf %70 : vector<128x128xf32> to vector<128x128xbf16>
    %c2_59 = arith.constant 2 : index
    %c0_60 = arith.constant 0 : index
    %c0_61 = arith.constant 0 : index
    %72 = vector.load %arg4[%c2_59, %c0_60, %c0_61] : memref<3x128x128xbf16, #tpu.memory_space<vmem>>, vector<1x128x128xbf16>
    %73 = vector.shape_cast %72 : vector<1x128x128xbf16> to vector<128x128xbf16>
    %cst_62 = arith.constant dense<0.000000e+00> : vector<128x128xf32>
    %74 = tpu.matmul %71, %73, %cst_62 {dimension_numbers = #tpu.dot_dimension_numbers<[1], [0], [0], [1], [0, 0, 1, 1], [], []>} : vector<128x128xbf16>, vector<128x128xbf16>, vector<128x128xf32> -> vector<128x128xf32>
    %c2_63 = arith.constant 2 : index
    %c0_64 = arith.constant 0 : index
    %c0_65 = arith.constant 0 : index
    %75 = vector.load %arg5[%c2_63, %c0_64, %c0_65] : memref<3x1x128xf32, #tpu.memory_space<vmem>>, vector<1x1x128xf32>
    %76 = vector.shape_cast %75 : vector<1x1x128xf32> to vector<1x128xf32>
    %77 = vector.broadcast %76 : vector<1x128xf32> to vector<128x128xf32>
    %78 = arith.addf %74, %77 : vector<128x128xf32>
    %cst_66 = arith.constant 0.000000e+00 : f32
    %79 = vector.broadcast %cst_66 : f32 to vector<128x128xf32>
    %80 = arith.maximumf %78, %79 : vector<128x128xf32>
    %81 = arith.truncf %80 : vector<128x128xf32> to vector<128x128xbf16>
    %c0_67 = arith.constant 0 : index
    %c0_68 = arith.constant 0 : index
    %82 = vector.load %arg14[%c0_67, %c0_68] : memref<128x128xbf16, #tpu.memory_space<vmem>>, vector<128x128xbf16>
    tpu.vector_store %arg14[%c0_67, %c0_68], %81 {strides = array<i32>} : memref<128x128xbf16, #tpu.memory_space<vmem>>, vector<128x128xbf16>,
    %c0_69 = arith.constant 0 : index
    %c0_70 = arith.constant 0 : index
    %83 = vector.load %arg6[%c0_69, %c0_70] : memref<8x128xbf16, #tpu.memory_space<vmem>>, vector<8x128xbf16>
    %c0_71 = arith.constant 0 : index
    %c0_72 = arith.constant 0 : index
    %84 = vector.load %arg14[%c0_71, %c0_72] : memref<128x128xbf16, #tpu.memory_space<vmem>>, vector<128x128xbf16>
    %cst_73 = arith.constant dense<0.000000e+00> : vector<8x128xf32>
    %85 = tpu.matmul %83, %84, %cst_73 {dimension_numbers = #tpu.dot_dimension_numbers<[1], [0], [0], [1], [0, 0, 1, 1], [], []>} : vector<8x128xbf16>, vector<128x128xbf16>, vector<8x128xf32> -> vector<8x128xf32>
    %86 = arith.truncf %85 : vector<8x128xf32> to vector<8x128xbf16>
    %c0_74 = arith.constant 0 : index
    %c0_75 = arith.constant 0 : index
    %87 = vector.load %arg7[%c0_74, %c0_75] : memref<128x128xbf16, #tpu.memory_space<vmem>>, vector<128x128xbf16>
    %cst_76 = arith.constant dense<0.000000e+00> : vector<8x128xf32>
    %88 = tpu.matmul %86, %87, %cst_76 {dimension_numbers = #tpu.dot_dimension_numbers<[1], [0], [0], [1], [0, 0, 1, 1], [], []>} : vector<8x128xbf16>, vector<128x128xbf16>, vector<8x128xf32> -> vector<8x128xf32>
    %c0_77 = arith.constant 0 : index
    %c0_78 = arith.constant 0 : index
    %89 = vector.load %arg8[%c0_77, %c0_78] : memref<1x128xf32, #tpu.memory_space<vmem>>, vector<1x128xf32>
    %90 = vector.broadcast %89 : vector<1x128xf32> to vector<8x128xf32>
    %91 = arith.addf %88, %90 : vector<8x128xf32>
    %cst_79 = arith.constant 0.000000e+00 : f32
    %92 = vector.broadcast %cst_79 : f32 to vector<8x128xf32>
    %93 = arith.maximumf %91, %92 : vector<8x128xf32>
    %94 = arith.truncf %93 : vector<8x128xf32> to vector<8x128xbf16>
    %c0_80 = arith.constant 0 : index
    %c0_81 = arith.constant 0 : index
    %95 = vector.load %arg9[%c0_80, %c0_81] : memref<128x128xbf16, #tpu.memory_space<vmem>>, vector<128x128xbf16>
    %cst_82 = arith.constant dense<0.000000e+00> : vector<8x128xf32>
    %96 = tpu.matmul %94, %95, %cst_82 {dimension_numbers = #tpu.dot_dimension_numbers<[1], [0], [0], [1], [0, 0, 1, 1], [], []>} : vector<8x128xbf16>, vector<128x128xbf16>, vector<8x128xf32> -> vector<8x128xf32>
    %c0_83 = arith.constant 0 : index
    %c0_84 = arith.constant 0 : index
    %97 = vector.load %arg10[%c0_83, %c0_84] : memref<1x128xf32, #tpu.memory_space<vmem>>, vector<1x128xf32>
    %98 = vector.broadcast %97 : vector<1x128xf32> to vector<8x128xf32>
    %99 = arith.addf %96, %98 : vector<8x128xf32>
    %cst_85 = arith.constant 0.000000e+00 : f32
    %100 = vector.broadcast %cst_85 : f32 to vector<8x128xf32>
    %101 = arith.maximumf %99, %100 : vector<8x128xf32>
    %102 = arith.truncf %101 : vector<8x128xf32> to vector<8x128xbf16>
    %c0_86 = arith.constant 0 : index
    %c0_87 = arith.constant 0 : index
    %103 = vector.load %arg11[%c0_86, %c0_87] : memref<128x128xbf16, #tpu.memory_space<vmem>>, vector<128x128xbf16>
    %cst_88 = arith.constant dense<0.000000e+00> : vector<8x128xf32>
    %104 = tpu.matmul %102, %103, %cst_88 {dimension_numbers = #tpu.dot_dimension_numbers<[1], [0], [0], [1], [0, 0, 1, 1], [], []>} : vector<8x128xbf16>, vector<128x128xbf16>, vector<8x128xf32> -> vector<8x128xf32>
    %c0_89 = arith.constant 0 : index
    %c0_90 = arith.constant 0 : index
    %105 = vector.load %arg12[%c0_89, %c0_90] : memref<1x128xf32, #tpu.memory_space<vmem>>, vector<1x128xf32>
    %106 = vector.broadcast %105 : vector<1x128xf32> to vector<8x128xf32>
    %107 = arith.addf %104, %106 : vector<8x128xf32>
    %c0_91 = arith.constant 0 : index
    %c0_92 = arith.constant 0 : index
    %108 = vector.load %arg13[%c0_91, %c0_92] : memref<8x128xf32, #tpu.memory_space<vmem>>, vector<8x128xf32>
    tpu.vector_store %arg13[%c0_91, %c0_92], %107 {strides = array<i32>} : memref<8x128xf32, #tpu.memory_space<vmem>>, vector<8x128xf32>,
    return
  }
}

</mosaic_0001>

<bundles_post_ra>
// kernel: gin_forward.1
= control target key start
LH: loop header
LB: loop body
LE: loop exit
PB: predicated region body
PF: predicated region fallthrough
CT: control target
= control target key end

     0   :  { %s3273_s1 = inlined_call_operand.vmem [shape: bf16[128,128], index: 1, kind: input, shape index: {}]   ;;  %s3274_s0 = inlined_call_operand.vmem [shape: bf16[128,128], index: 0, kind: input, shape index: {}]   ;;  %s3275_s2 = inlined_call_operand.vmem [shape: bf16[3,128,128], index: 2, kind: input, shape index: {}]   ;;  %s3276_s3 = inlined_call_operand.vmem [shape: f32[3,1,128], index: 3, kind: input, shape index: {}]   ;;  %s3277_s4 = inlined_call_operand.vmem [shape: bf16[3,128,128], index: 4, kind: input, shape index: {}]   ;;  %s3278_s5 = inlined_call_operand.vmem [shape: f32[3,1,128], index: 5, kind: input, shape index: {}]   ;;  %s3279_s7 = inlined_call_operand.vmem [shape: bf16[128,128], index: 7, kind: input, shape index: {}]   ;;  %s3280_s6 = inlined_call_operand.vmem [shape: bf16[8,128], index: 6, kind: input, shape index: {}]   ;;  %s3281_s8 = inlined_call_operand.vmem [shape: f32[1,128], index: 8, kind: input, shape index: {}]   ;;  %s3282_s9 = inlined_call_operand.vmem [shape: bf16[128,128], index: 9, kind: input, shape index: {}]   ;;  %s3283_s10 = inlined_call_operand.vmem [shape: f32[1,128], index: 10, kind: input, shape index: {}]   ;;  %s3284_s11 = inlined_call_operand.vmem [shape: bf16[128,128], index: 11, kind: input, shape index: {}]   ;;  %s3285_s12 = inlined_call_operand.vmem [shape: f32[1,128], index: 12, kind: input, shape index: {}]   ;;  %s3286_s13 = inlined_call_operand.vmem [shape: f32[8,128], index: 13, kind: output, shape index: {}]  }
   0x1   :  { %v58_v0 = vld [vmem:[%s3273_s1 + $0x38] sm:$0xff]   ;;  %v56_v1 = vld [vmem:[%s3273_s1 + $0x30] sm:$0xff]   ;;  %v54_v2 = vld [vmem:[%s3273_s1 + $0x28] sm:$0xff]  }
   0x2   :  { %74 = vst [vmem:[#allocation2 + $0x38] sm:$0xff] %v58_v0   ;;  %v52_v3 = vld [vmem:[%s3273_s1 + $0x20] sm:$0xff]   ;;  %v50_v4 = vld [vmem:[%s3273_s1 + $0x18] sm:$0xff]   ;;  %v48_v5 = vld [vmem:[%s3273_s1 + $0x10] sm:$0xff]  }
   0x3   :  { %72 = vst [vmem:[#allocation2 + $0x30] sm:$0xff] %v56_v1   ;;  %v46_v6 = vld [vmem:[%s3273_s1 + $0x8] sm:$0xff]   ;;  %v44_v7 = vld [vmem:[%s3273_s1] sm:$0xff]   ;;  %v2578_v19 = vld [vmem:[%s3274_s0 + $0x30] sm:$0xff] }
   0x4   :  { %70 = vst [vmem:[#allocation2 + $0x28] sm:$0xff] %v54_v2   ;;  %v2572_v16 = vld [vmem:[%s3274_s0] sm:$0xff]  ;;  %v2573_v17 = vld [vmem:[%s3274_s0 + $0x8] sm:$0xff]  ;;  %v2587_v20 = vld [vmem:[%s3275_s2 + $0x38] sm:$0xff] }
   0x5   :  { %68 = vst [vmem:[#allocation2 + $0x20] sm:$0xff] %v52_v3   ;;  %v2576_v18 = vld [vmem:[%s3274_s0 + $0x20] sm:$0xff]  ;;  %361 = vmatpush.bf16.msra.mxu1 %v2587_v20  ;;  %v2586_v21 = vld [vmem:[%s3275_s2 + $0x30] sm:$0xff]  ;;  %v2585_v22 = vld [vmem:[%s3275_s2 + $0x28] sm:$0xff] }
   0x6   :  { %66 = vst [vmem:[#allocation2 + $0x18] sm:$0xff] %v50_v4   ;;  %v2584_v23 = vld [vmem:[%s3275_s2 + $0x20] sm:$0xff]  ;;  %v2574_v24 = vld [vmem:[%s3274_s0 + $0x10] sm:$0xff]  ;;  %v2577_v25 = vld [vmem:[%s3274_s0 + $0x28] sm:$0xff] }
   0x7   :  { %64 = vst [vmem:[#allocation2 + $0x10] sm:$0xff] %v48_v5   ;;  %v2579_v26 = vld [vmem:[%s3274_s0 + $0x38] sm:$0xff]  ;;  %v2582_v29 = vld [vmem:[%s3275_s2 + $0x10] sm:$0xff]  ;;  %v2581_v30 = vld [vmem:[%s3275_s2 + $0x8] sm:$0xff] }
   0x8   :  { %62 = vst [vmem:[#allocation2 + $0x8] sm:$0xff] %v46_v6   ;;  %v2583_v27 = vld [vmem:[%s3275_s2 + $0x18] sm:$0xff]  ;;  %v2580_v31 = vld [vmem:[%s3275_s2] sm:$0xff] }
   0x9   :  { %v2571_v8 = vld [vmem:[#allocation2 + $0x38] sm:$0xff]  ;;  %60 = vst [vmem:[#allocation2] sm:$0xff] %v44_v7   ;;  %362 = vmatpush.bf16.msra.mxu1 %v2586_v21 }
   0xa   :  { %204 = vmatpush.bf16.msra.mxu0 %v2571_v8  ;;  %v2570_v9 = vld [vmem:[#allocation2 + $0x30] sm:$0xff]  ;;  %2833 = vmatpush.bf16.msra.mxu2 %v2571_v8  ;;  %v2575_v28 = vld [vmem:[%s3274_s0 + $0x18] sm:$0xff] }
   0xb   :  { %2834 = vmatpush.bf16.msra.mxu3 %v2571_v8  ;;  %v2569_v10 = vld [vmem:[#allocation2 + $0x28] sm:$0xff]  ;;  %v88_v20 = vld [vmem:[#allocation2 + $0x30] sm:$0xff]  }
   0xc   :  { %v2568_v11 = vld [vmem:[#allocation2 + $0x20] sm:$0xff] }
   0xd   :  { %v2567_v12 = vld [vmem:[#allocation2 + $0x18] sm:$0xff]  ;;  %363 = vmatpush.bf16.msra.mxu1 %v2585_v22  ;;  %v84_v1 = vld [vmem:[#allocation2 + $0x20] sm:$0xff]  }
   0xe   :  { %205 = vmatpush.bf16.msra.mxu0 %v2570_v9  ;;  %2835 = vmatpush.bf16.msra.mxu2 %v2570_v9  ;;  %v2566_v13 = vld [vmem:[#allocation2 + $0x10] sm:$0xff]  ;;  %v82_v57 = vld [vmem:[#allocation2 + $0x18] sm:$0xff]   ;;  %v261_v3 = vunpack.c.l.bf16 %v84_v1  ;;  %v262_v4 = vunpack.c.h.bf16 %v84_v1  ;;  %v2592_v22 = vld [vmem:[%s3277_s4 + $0x20] sm:$0xff] }
   0xf   :  { %2836 = vmatpush.bf16.msra.mxu3 %v2570_v9  ;;  %v2565_v14 = vld [vmem:[#allocation2 + $0x8] sm:$0xff]  ;;  %v80_v49 = vld [vmem:[#allocation2 + $0x10] sm:$0xff]   ;;  %v259_v58 = vunpack.c.l.bf16 %v82_v57  ;;  %v260_v59 = vunpack.c.h.bf16 %v82_v57  ;;  %v2595_v9 = vld [vmem:[%s3277_s4 + $0x38] sm:$0xff] }
  0x10   :  { %v2564_v15 = vld [vmem:[#allocation2] sm:$0xff]  ;;  %v78_v41 = vld [vmem:[#allocation2 + $0x8] sm:$0xff]   ;;  %v257_v50 = vunpack.c.l.bf16 %v80_v49  ;;  %v258_v51 = vunpack.c.h.bf16 %v80_v49 }
  0x11   :  { %364 = vmatpush.bf16.msra.mxu1 %v2584_v23  ;;  %v76_v33 = vld [vmem:[#allocation2] sm:$0xff]   ;;  %v255_v42 = vunpack.c.l.bf16 %v78_v41  ;;  %v256_v43 = vunpack.c.h.bf16 %v78_v41  ;;  %v265_v23 = vunpack.c.l.bf16 %v88_v20 }
  0x12   :  { %206 = vmatpush.bf16.msra.mxu0 %v2569_v10  ;;  %2837 = vmatpush.bf16.msra.mxu2 %v2569_v10  ;;  %v253_v34 = vunpack.c.l.bf16 %v76_v33  ;;  %v254_v35 = vunpack.c.h.bf16 %v76_v33  ;;  %v2849_v41 = vld [vmem:[%s3276_s3] ss:$0 sm:$0xff] }
  0x13   :  { %2838 = vmatpush.bf16.msra.mxu3 %v2569_v10  ;;  %v86_v10 = vld [vmem:[#allocation2 + $0x28] sm:$0xff]  }
  0x15   :  { %365 = vmatpush.bf16.msra.mxu1 %v2583_v27  ;;  %v2591_v27 = vld [vmem:[%s3277_s4 + $0x18] sm:$0xff] }
  0x16   :  { %207 = vmatpush.bf16.msra.mxu0 %v2568_v11  ;;  %2839 = vmatpush.bf16.msra.mxu2 %v2568_v11 }
  0x17   :  { %2840 = vmatpush.bf16.msra.mxu3 %v2568_v11  ;;  %v263_v11 = vunpack.c.l.bf16 %v86_v10 }
  0x19   :  { %366 = vmatpush.bf16.msra.mxu1 %v2582_v29 }
  0x1a   :  { %208 = vmatpush.bf16.msra.mxu0 %v2567_v12  ;;  %2841 = vmatpush.bf16.msra.mxu2 %v2567_v12 }
  0x1b   :  { %2842 = vmatpush.bf16.msra.mxu3 %v2567_v12  ;;  %v264_v12 = vunpack.c.h.bf16 %v86_v10 }
  0x1d   :  { %367 = vmatpush.bf16.msra.mxu1 %v2581_v30  ;;  %v2590_v30 = vld [vmem:[%s3277_s4 + $0x10] sm:$0xff] }
  0x1e   :  { %209 = vmatpush.bf16.msra.mxu0 %v2566_v13  ;;  %2843 = vmatpush.bf16.msra.mxu2 %v2566_v13 }
  0x1f   :  { %2844 = vmatpush.bf16.msra.mxu3 %v2566_v13 }
  0x21   :  { %368 = vmatpush.bf16.msra.mxu1 %v2580_v31  ;;  %v90_v31 = vld [vmem:[#allocation2 + $0x38] sm:$0xff]  }
  0x22   :  { %210 = vmatpush.bf16.msra.mxu0 %v2565_v14  ;;  %2845 = vmatpush.bf16.msra.mxu2 %v2565_v14  ;;  %v267_v33 = vunpack.c.l.bf16 %v90_v31 }
  0x23   :  { %2846 = vmatpush.bf16.msra.mxu3 %v2565_v14 }
  0x26   :  { %211 = vmatpush.bf16.msra.mxu0 %v2564_v15  ;;  %2847 = vmatpush.bf16.msra.mxu2 %v2564_v15 }
  0x27   :  { %2848 = vmatpush.bf16.msra.mxu3 %v2564_v15 }
  0x29   :  { %212 = vmatmul.bf16.vlgmr.msra.gmra.mxu0 %v2572_v16  ;;  %232 = vmatmul.bf16.vlgmr.msra.gmra.mxu2 %v2576_v18  ;;  %v2594_v18 = vld [vmem:[%s3277_s4 + $0x30] sm:$0xff] }
  0x2a   :  { %242 = vmatmul.bf16.vlgmr.msra.gmra.mxu3 %v2578_v19  ;;  %502 = vmatpush.bf16.msrb.mxu2 %v2595_v9  ;;  %v2593_v19 = vld [vmem:[%s3277_s4 + $0x28] sm:$0xff] }
  0x2e   :  { %503 = vmatpush.bf16.msrb.mxu2 %v2594_v18 }
  0x32   :  { %504 = vmatpush.bf16.msrb.mxu2 %v2593_v19 }
  0x36   :  { %505 = vmatpush.bf16.msrb.mxu2 %v2592_v22 }
  0x39   :  { %217 = vmatmul.bf16.gmra.mxu0 %v2573_v17  ;;  %237 = vmatmul.bf16.gmra.mxu2 %v2577_v25 }
  0x3a   :  { %247 = vmatmul.bf16.gmra.mxu3 %v2579_v26  ;;  %506 = vmatpush.bf16.msrb.mxu2 %v2591_v27 }
  0x3e   :  { %507 = vmatpush.bf16.msrb.mxu2 %v2590_v30 }
  0x49   :  { %222 = vmatmul.bf16.gmra.mxu0 %v2574_v24  ;;  %v266_v24 = vunpack.c.h.bf16 %v88_v20 }
  0x59   :  { %227 = vmatmul.bf16.gmra.mxu0 %v2575_v28 }
  0xa6   :  { %v213_v32 = vpop.f32.mrf.mxu0 }
  0xa7   :  { %v269_v37 = vadd.f32 %v253_v34, %v213_v32  ;;  %v2589_v32 = vld [vmem:[%s3277_s4 + $0x8] sm:$0xff]  ;;  %v268_v34 = vunpack.c.h.bf16 %v90_v31 }
  0xa8   :  { %508 = vmatpush.bf16.msrb.mxu2 %v2589_v32 }
  0xac   :  { %v233_v60 = vpop.f32.mrf.mxu2 }
  0xad   :  { %v277_v5 = vadd.f32 %v261_v3, %v233_v60  ;;  %v243_v14 = vpop.f32.mrf.mxu3 }
  0xae   :  { %v215_v36 = vpop.f32.mrf.mxu0  ;;  %v281_v25 = vadd.f32 %v265_v23, %v243_v14 }
  0xaf   :  { %v270_v38 = vadd.f32 %v254_v35, %v215_v36  ;;  %v2588_v36 = vld [vmem:[%s3277_s4] sm:$0xff] }
  0xb0   :  { %509 = vmatpush.bf16.msrb.mxu2 %v2588_v36 }
  0xb1   :  { %v285_v39 = vpack.c.bf16 %v270_v38, %v269_v37 }
  0xb3   :  { %369 = vmatmul.bf16.vlgmr.msra.gmra.mxu1 %v285_v39 }
  0xb4   :  { %v235_v2 = vpop.f32.mrf.mxu2 }
  0xb5   :  { %v278_v6 = vadd.f32 %v262_v4, %v235_v2  ;;  %v245_v21 = vpop.f32.mrf.mxu3 }
  0xb6   :  { %v218_v40 = vpop.f32.mrf.mxu0  ;;  %v282_v26 = vadd.f32 %v266_v24, %v245_v21 }
  0xb7   :  { %v271_v45 = vadd.f32 %v255_v42, %v218_v40  ;;  %v289_v8 = vpack.c.bf16 %v278_v6, %v277_v5 }
  0xb8   :  { %v291_v29 = vpack.c.bf16 %v282_v26, %v281_v25 }
  0xbc   :  { %v238_v7 = vpop.f32.mrf.mxu2 }
  0xbd   :  { %v279_v15 = vadd.f32 %v263_v11, %v238_v7  ;;  %v248_v28 = vpop.f32.mrf.mxu3 }
  0xbe   :  { %v220_v44 = vpop.f32.mrf.mxu0  ;;  %v283_v37 = vadd.f32 %v267_v33, %v248_v28 }
  0xbf   :  { %v272_v46 = vadd.f32 %v256_v43, %v220_v44 }
  0xc1   :  { %v286_v47 = vpack.c.bf16 %v272_v46, %v271_v45 }
  0xc3   :  { %374 = vmatmul.bf16.gmra.mxu1 %v286_v47 }
  0xc4   :  { %v240_v13 = vpop.f32.mrf.mxu2 }
  0xc5   :  { %v280_v16 = vadd.f32 %v264_v12, %v240_v13  ;;  %v250_v35 = vpop.f32.mrf.mxu3 }
  0xc6   :  { %v223_v48 = vpop.f32.mrf.mxu0  ;;  %v284_v38 = vadd.f32 %v268_v34, %v250_v35  ;;  %v2850_v34 = vld [vmem:[%s3278_s5] ss:$0 sm:$0xff] }
  0xc7   :  { %v273_v53 = vadd.f32 %v257_v50, %v223_v48  ;;  %v290_v17 = vpack.c.bf16 %v280_v16, %v279_v15 }
  0xc8   :  { %v292_v39 = vpack.c.bf16 %v284_v38, %v283_v37 }
  0xce   :  { %v225_v52 = vpop.f32.mrf.mxu0 }
  0xcf   :  { %v274_v54 = vadd.f32 %v258_v51, %v225_v52 }
  0xd1   :  { %v287_v55 = vpack.c.bf16 %v274_v54, %v273_v53 }
  0xd3   :  { %379 = vmatmul.bf16.gmra.mxu1 %v287_v55 }
  0xd6   :  { %v228_v56 = vpop.f32.mrf.mxu0 }
  0xd7   :  { %v275_v62 = vadd.f32 %v259_v58, %v228_v56 }
  0xde   :  { %v230_v61 = vpop.f32.mrf.mxu0 }
  0xdf   :  { %v276_v63 = vadd.f32 %v260_v59, %v230_v61 }
  0xe1   :  { %v288_v0 = vpack.c.bf16 %v276_v63, %v275_v62 }
  0xe3   :  { %384 = vmatmul.bf16.gmra.mxu1 %v288_v0 }
  0xf3   :  { %389 = vmatmul.bf16.gmra.mxu1 %v289_v8 }
 0x103   :  { %394 = vmatmul.bf16.gmra.mxu1 %v290_v17 }
 0x113   :  { %399 = vmatmul.bf16.gmra.mxu1 %v291_v29 }
 0x123   :  { %404 = vmatmul.bf16.gmra.mxu1 %v292_v39 }
 0x130   :  { %v370_v40 = vpop.f32.mrf.mxu1 }
 0x131   :  { %v371_v42 = vadd.f32 %v2849_v41, %v370_v40 }
 0x133   :  { %v410_v45 = vmax.f32 %v371_v42, 0.0 }
 0x138   :  { %v372_v43 = vpop.f32.mrf.mxu1 }
 0x139   :  { %v373_v44 = vadd.f32 %v2849_v41, %v372_v43 }
 0x13b   :  { %v411_v46 = vmax.f32 %v373_v44, 0.0 }
 0x13d   :  { %v426_v47 = vpack.c.bf16 %v411_v46, %v410_v45 }
 0x13f   :  { %510 = vmatmul.bf16.vlgmr.msrb.gmra.mxu2 %v426_v47 }
 0x140   :  { %v375_v48 = vpop.f32.mrf.mxu1 }
 0x141   :  { %v376_v49 = vadd.f32 %v2849_v41, %v375_v48 }
 0x143   :  { %v412_v52 = vmax.f32 %v376_v49, 0.0 }
 0x148   :  { %v377_v50 = vpop.f32.mrf.mxu1 }
 0x149   :  { %v378_v51 = vadd.f32 %v2849_v41, %v377_v50 }
 0x14b   :  { %v413_v53 = vmax.f32 %v378_v51, 0.0 }
 0x14d   :  { %v427_v54 = vpack.c.bf16 %v413_v53, %v412_v52 }
 0x14f   :  { %515 = vmatmul.bf16.gmra.mxu2 %v427_v54 }
 0x150   :  { %v380_v55 = vpop.f32.mrf.mxu1 }
 0x151   :  { %v381_v56 = vadd.f32 %v2849_v41, %v380_v55 }
 0x153   :  { %v414_v59 = vmax.f32 %v381_v56, 0.0 }
 0x158   :  { %v382_v57 = vpop.f32.mrf.mxu1 }
 0x159   :  { %v383_v58 = vadd.f32 %v2849_v41, %v382_v57 }
 0x15b   :  { %v415_v60 = vmax.f32 %v383_v58, 0.0 }
 0x15d   :  { %v428_v61 = vpack.c.bf16 %v415_v60, %v414_v59 }
 0x15f   :  { %520 = vmatmul.bf16.gmra.mxu2 %v428_v61 }
 0x160   :  { %v385_v62 = vpop.f32.mrf.mxu1 }
 0x161   :  { %v386_v63 = vadd.f32 %v2849_v41, %v385_v62 }
 0x163   :  { %v416_v2 = vmax.f32 %v386_v63, 0.0 }
 0x168   :  { %v387_v0 = vpop.f32.mrf.mxu1 }
 0x169   :  { %v388_v1 = vadd.f32 %v2849_v41, %v387_v0 }
 0x16b   :  { %v417_v3 = vmax.f32 %v388_v1, 0.0 }
 0x16d   :  { %v429_v4 = vpack.c.bf16 %v417_v3, %v416_v2 }
 0x16f   :  { %525 = vmatmul.bf16.gmra.mxu2 %v429_v4 }
 0x170   :  { %v390_v5 = vpop.f32.mrf.mxu1 }
 0x171   :  { %v391_v6 = vadd.f32 %v2849_v41, %v390_v5 }
 0x173   :  { %v418_v9 = vmax.f32 %v391_v6, 0.0 }
 0x178   :  { %v392_v7 = vpop.f32.mrf.mxu1 }
 0x179   :  { %v393_v8 = vadd.f32 %v2849_v41, %v392_v7 }
 0x17b   :  { %v419_v10 = vmax.f32 %v393_v8, 0.0 }
 0x17d   :  { %v430_v11 = vpack.c.bf16 %v419_v10, %v418_v9 }
 0x17f   :  { %530 = vmatmul.bf16.gmra.mxu2 %v430_v11 }
 0x180   :  { %v395_v12 = vpop.f32.mrf.mxu1 }
 0x181   :  { %v396_v13 = vadd.f32 %v2849_v41, %v395_v12 }
 0x183   :  { %v420_v16 = vmax.f32 %v396_v13, 0.0 }
 0x188   :  { %v397_v14 = vpop.f32.mrf.mxu1 }
 0x189   :  { %v398_v15 = vadd.f32 %v2849_v41, %v397_v14 }
 0x18b   :  { %v421_v17 = vmax.f32 %v398_v15, 0.0 }
 0x18d   :  { %v431_v18 = vpack.c.bf16 %v421_v17, %v420_v16 }
 0x18f   :  { %535 = vmatmul.bf16.gmra.mxu2 %v431_v18 }
 0x190   :  { %v400_v19 = vpop.f32.mrf.mxu1 }
 0x191   :  { %v401_v20 = vadd.f32 %v2849_v41, %v400_v19 }
 0x193   :  { %v422_v23 = vmax.f32 %v401_v20, 0.0 }
 0x198   :  { %v402_v21 = vpop.f32.mrf.mxu1 }
 0x199   :  { %v403_v22 = vadd.f32 %v2849_v41, %v402_v21 }
 0x19b   :  { %v423_v24 = vmax.f32 %v403_v22, 0.0 }
 0x19d   :  { %v432_v25 = vpack.c.bf16 %v423_v24, %v422_v23 }
 0x19f   :  { %540 = vmatmul.bf16.gmra.mxu2 %v432_v25 }
 0x1a0   :  { %v405_v26 = vpop.f32.mrf.mxu1 }
 0x1a1   :  { %v406_v27 = vadd.f32 %v2849_v41, %v405_v26 }
 0x1a3   :  { %v424_v30 = vmax.f32 %v406_v27, 0.0 }
 0x1a8   :  { %v407_v28 = vpop.f32.mrf.mxu1 }
 0x1a9   :  { %v408_v29 = vadd.f32 %v2849_v41, %v407_v28 }
 0x1ab   :  { %v425_v31 = vmax.f32 %v408_v29, 0.0 }
 0x1ad   :  { %v433_v32 = vpack.c.bf16 %v425_v31, %v424_v30 }
 0x1af   :  { %545 = vmatmul.bf16.gmra.mxu2 %v433_v32 }
 0x1c2   :  { %v511_v33 = vpop.f32.mrf.mxu2 }
 0x1c3   :  { %v512_v35 = vadd.f32 %v2850_v34, %v511_v33 }
 0x1c5   :  { %v551_v38 = vmax.f32 %v512_v35, 0.0  ;;  %v2605_v35 = vld [vmem:[%s3274_s0 + $0x8] sm:$0xff] }
 0x1ca   :  { %v513_v36 = vpop.f32.mrf.mxu2 }
 0x1cb   :  { %v514_v37 = vadd.f32 %v2850_v34, %v513_v36  ;;  %v2606_v36 = vld [vmem:[%s3274_s0 + $0x10] sm:$0xff] }
 0x1cd   :  { %v552_v39 = vmax.f32 %v514_v37, 0.0  ;;  %v2607_v37 = vld [vmem:[%s3274_s0 + $0x18] sm:$0xff] }
 0x1cf   :  { %v2695_v40 = vpack.c.bf16 %v552_v39, %v551_v38  ;;  %v2608_v38 = vld [vmem:[%s3274_s0 + $0x20] sm:$0xff]  ;;  %v2609_v39 = vld [vmem:[%s3274_s0 + $0x28] sm:$0xff] }
 0x1d1   :  { %2696 = vst [vmem:[#allocation2] sm:$0xff] %v2695_v40   ;;  %v2619_v40 = vld [vmem:[%s3275_s2 + $0x78] sm:$0xff] }
 0x1d2   :  { %v516_v42 = vpop.f32.mrf.mxu2  ;;  %886 = vmatpush.bf16.msrb.mxu0 %v2619_v40 }
 0x1d3   :  { %v517_v43 = vadd.f32 %v2850_v34, %v516_v42  ;;  %v2618_v42 = vld [vmem:[%s3275_s2 + $0x70] sm:$0xff] }
 0x1d5   :  { %v553_v45 = vmax.f32 %v517_v43, 0.0  ;;  %v2617_v43 = vld [vmem:[%s3275_s2 + $0x68] sm:$0xff] }
 0x1d6   :  { %887 = vmatpush.bf16.msrb.mxu0 %v2618_v42 }
 0x1d8   :  { %v2596_v33 = vld [vmem:[#allocation2] sm:$0xff] }
 0x1da   :  { %v518_v44 = vpop.f32.mrf.mxu2  ;;  %888 = vmatpush.bf16.msrb.mxu0 %v2617_v43 }
 0x1db   :  { %v519_v41 = vadd.f32 %v2850_v34, %v518_v44  ;;  %v2616_v44 = vld [vmem:[%s3275_s2 + $0x60] sm:$0xff] }
 0x1dd   :  { %v554_v46 = vmax.f32 %v519_v41, 0.0  ;;  %v2610_v41 = vld [vmem:[%s3274_s0 + $0x30] sm:$0xff] }
 0x1de   :  { %889 = vmatpush.bf16.msrb.mxu0 %v2616_v44  ;;  %v2623_v44 = vld [vmem:[%s3277_s4 + $0x58] sm:$0xff] }
 0x1df   :  { %v2700_v47 = vpack.c.bf16 %v554_v46, %v553_v45  ;;  %v2615_v45 = vld [vmem:[%s3275_s2 + $0x58] sm:$0xff]  ;;  %v2614_v46 = vld [vmem:[%s3275_s2 + $0x50] sm:$0xff] }
 0x1e1   :  { %2812 = vst [vmem:[#allocation2 + $0x8] sm:$0xff] %v2700_v47   ;;  %v2613_v47 = vld [vmem:[%s3275_s2 + $0x48] sm:$0xff] }
 0x1e2   :  { %v521_v48 = vpop.f32.mrf.mxu2  ;;  %890 = vmatpush.bf16.msrb.mxu0 %v2615_v45 }
 0x1e3   :  { %v522_v49 = vadd.f32 %v2850_v34, %v521_v48  ;;  %v2612_v48 = vld [vmem:[%s3275_s2 + $0x40] sm:$0xff] }
 0x1e5   :  { %v555_v52 = vmax.f32 %v522_v49, 0.0  ;;  %v2611_v49 = vld [vmem:[%s3274_s0 + $0x38] sm:$0xff] }
 0x1e6   :  { %891 = vmatpush.bf16.msrb.mxu0 %v2614_v46 }
 0x1e8   :  { %v2597_v32 = vld [vmem:[#allocation2 + $0x8] sm:$0xff] }
 0x1ea   :  { %v523_v50 = vpop.f32.mrf.mxu2  ;;  %892 = vmatpush.bf16.msrb.mxu0 %v2613_v47  ;;  %v2622_v47 = vld [vmem:[%s3277_s4 + $0x50] sm:$0xff] }
 0x1eb   :  { %v524_v51 = vadd.f32 %v2850_v34, %v523_v50 }
 0x1ed   :  { %v556_v53 = vmax.f32 %v524_v51, 0.0  ;;  %v599_v51 = vld [vmem:[#allocation2] sm:$0xff]  }
 0x1ee   :  { %893 = vmatpush.bf16.msrb.mxu0 %v2612_v48 }
 0x1ef   :  { %v2705_v54 = vpack.c.bf16 %v556_v53, %v555_v52  ;;  %v776_v52 = vunpack.c.l.bf16 %v599_v51  ;;  %v777_v53 = vunpack.c.h.bf16 %v599_v51  ;;  %v2620_v51 = vld [vmem:[%s3277_s4 + $0x40] sm:$0xff] }
 0x1f1   :  { %2813 = vst [vmem:[#allocation2 + $0x10] sm:$0xff] %v2705_v54  }
 0x1f2   :  { %v526_v55 = vpop.f32.mrf.mxu2 }
 0x1f3   :  { %v527_v56 = vadd.f32 %v2850_v34, %v526_v55 }
 0x1f5   :  { %v557_v59 = vmax.f32 %v527_v56, 0.0 }
 0x1f8   :  { %v2598_v31 = vld [vmem:[#allocation2 + $0x10] sm:$0xff] }
 0x1fa   :  { %v528_v57 = vpop.f32.mrf.mxu2 }
 0x1fb   :  { %v529_v58 = vadd.f32 %v2850_v34, %v528_v57 }
 0x1fd   :  { %v558_v60 = vmax.f32 %v529_v58, 0.0 }
 0x1ff   :  { %v2710_v61 = vpack.c.bf16 %v558_v60, %v557_v59  ;;  %v601_v59 = vld [vmem:[#allocation2 + $0x8] sm:$0xff]  }
 0x200   :  { %v778_v60 = vunpack.c.l.bf16 %v601_v59 }
 0x201   :  { %2814 = vst [vmem:[#allocation2 + $0x18] sm:$0xff] %v2710_v61   ;;  %v779_v61 = vunpack.c.h.bf16 %v601_v59  ;;  %v2851_v59 = vld [vmem:[%s3276_s3 + $0x1] ss:$0 sm:$0xff] }
 0x202   :  { %v531_v62 = vpop.f32.mrf.mxu2 }
 0x203   :  { %v532_v63 = vadd.f32 %v2850_v34, %v531_v62 }
 0x205   :  { %v559_v2 = vmax.f32 %v532_v63, 0.0 }
 0x208   :  { %v2599_v30 = vld [vmem:[#allocation2 + $0x18] sm:$0xff] }
 0x20a   :  { %v533_v0 = vpop.f32.mrf.mxu2 }
 0x20b   :  { %v534_v1 = vadd.f32 %v2850_v34, %v533_v0 }
 0x20d   :  { %v560_v3 = vmax.f32 %v534_v1, 0.0 }
 0x20f   :  { %v2715_v4 = vpack.c.bf16 %v560_v3, %v559_v2  ;;  %v603_v3 = vld [vmem:[#allocation2 + $0x10] sm:$0xff]  }
 0x211   :  { %2815 = vst [vmem:[#allocation2 + $0x20] sm:$0xff] %v2715_v4   ;;  %v780_v4 = vunpack.c.l.bf16 %v603_v3 }
 0x212   :  { %v536_v5 = vpop.f32.mrf.mxu2 }
 0x213   :  { %v537_v6 = vadd.f32 %v2850_v34, %v536_v5  ;;  %v781_v5 = vunpack.c.h.bf16 %v603_v3 }
 0x215   :  { %v561_v9 = vmax.f32 %v537_v6, 0.0 }
 0x218   :  { %v2600_v29 = vld [vmem:[#allocation2 + $0x20] sm:$0xff] }
 0x21a   :  { %v538_v7 = vpop.f32.mrf.mxu2 }
 0x21b   :  { %v539_v8 = vadd.f32 %v2850_v34, %v538_v7 }
 0x21d   :  { %v562_v10 = vmax.f32 %v539_v8, 0.0 }
 0x21f   :  { %v2720_v11 = vpack.c.bf16 %v562_v10, %v561_v9 }
 0x221   :  { %2816 = vst [vmem:[#allocation2 + $0x28] sm:$0xff] %v2720_v11   ;;  %v605_v11 = vld [vmem:[#allocation2 + $0x18] sm:$0xff]  }
 0x222   :  { %v541_v12 = vpop.f32.mrf.mxu2 }
 0x223   :  { %v542_v13 = vadd.f32 %v2850_v34, %v541_v12  ;;  %v782_v12 = vunpack.c.l.bf16 %v605_v11 }
 0x225   :  { %v563_v16 = vmax.f32 %v542_v13, 0.0  ;;  %v783_v13 = vunpack.c.h.bf16 %v605_v11 }
 0x228   :  { %v2601_v28 = vld [vmem:[#allocation2 + $0x28] sm:$0xff] }
 0x22a   :  { %v543_v14 = vpop.f32.mrf.mxu2 }
 0x22b   :  { %v544_v15 = vadd.f32 %v2850_v34, %v543_v14 }
 0x22d   :  { %v564_v17 = vmax.f32 %v544_v15, 0.0 }
 0x22f   :  { %v2725_v18 = vpack.c.bf16 %v564_v17, %v563_v16 }
 0x231   :  { %2817 = vst [vmem:[#allocation2 + $0x30] sm:$0xff] %v2725_v18  }
 0x232   :  { %v546_v19 = vpop.f32.mrf.mxu2 }
 0x233   :  { %v547_v20 = vadd.f32 %v2850_v34, %v546_v19  ;;  %v607_v19 = vld [vmem:[#allocation2 + $0x20] sm:$0xff]  }
 0x235   :  { %v565_v23 = vmax.f32 %v547_v20, 0.0  ;;  %v784_v20 = vunpack.c.l.bf16 %v607_v19 }
 0x238   :  { %v2602_v27 = vld [vmem:[#allocation2 + $0x30] sm:$0xff] }
 0x23a   :  { %v548_v21 = vpop.f32.mrf.mxu2 }
 0x23b   :  { %v549_v22 = vadd.f32 %v2850_v34, %v548_v21  ;;  %v2604_v34 = vld [vmem:[%s3274_s0] sm:$0xff]  ;;  %v785_v21 = vunpack.c.h.bf16 %v607_v19 }
 0x23d   :  { %v566_v24 = vmax.f32 %v549_v22, 0.0 }
 0x23f   :  { %v2730_v25 = vpack.c.bf16 %v566_v24, %v565_v23 }
 0x241   :  { %2818 = vst [vmem:[#allocation2 + $0x38] sm:$0xff] %v2730_v25  }
 0x248   :  { %v2603_v26 = vld [vmem:[#allocation2 + $0x38] sm:$0xff] }
 0x249   :  { %727 = vmatpush.bf16.msrb.mxu3 %v2603_v26 }
 0x24d   :  { %728 = vmatpush.bf16.msrb.mxu3 %v2602_v27  ;;  %v609_v27 = vld [vmem:[#allocation2 + $0x28] sm:$0xff]  }
 0x251   :  { %729 = vmatpush.bf16.msrb.mxu3 %v2601_v28  ;;  %v786_v28 = vunpack.c.l.bf16 %v609_v27 }
 0x255   :  { %730 = vmatpush.bf16.msrb.mxu3 %v2600_v29  ;;  %v787_v29 = vunpack.c.h.bf16 %v609_v27 }
 0x259   :  { %731 = vmatpush.bf16.msrb.mxu3 %v2599_v30 }
 0x25d   :  { %732 = vmatpush.bf16.msrb.mxu3 %v2598_v31  ;;  %v2627_v31 = vld [vmem:[%s3277_s4 + $0x78] sm:$0xff] }
 0x25e   :  { %1029 = vmatpush.bf16.msrb.mxu1 %v2627_v31 }
 0x261   :  { %733 = vmatpush.bf16.msrb.mxu3 %v2597_v32 }
 0x265   :  { %734 = vmatpush.bf16.msrb.mxu3 %v2596_v33 }
 0x268   :  { %735 = vmatmul.bf16.vlgmr.msrb.gmra.mxu3 %v2604_v34 }
 0x278   :  { %740 = vmatmul.bf16.gmra.mxu3 %v2605_v35  ;;  %v2626_v35 = vld [vmem:[%s3277_s4 + $0x70] sm:$0xff] }
 0x279   :  { %1030 = vmatpush.bf16.msrb.mxu1 %v2626_v35 }
 0x288   :  { %745 = vmatmul.bf16.gmra.mxu3 %v2606_v36  ;;  %v2625_v36 = vld [vmem:[%s3277_s4 + $0x68] sm:$0xff] }
 0x289   :  { %1031 = vmatpush.bf16.msrb.mxu1 %v2625_v36 }
 0x298   :  { %750 = vmatmul.bf16.gmra.mxu3 %v2607_v37 }
 0x2a8   :  { %755 = vmatmul.bf16.gmra.mxu3 %v2608_v38  ;;  %v2624_v38 = vld [vmem:[%s3277_s4 + $0x60] sm:$0xff] }
 0x2a9   :  { %1032 = vmatpush.bf16.msrb.mxu1 %v2624_v38 }
 0x2ad   :  { %1033 = vmatpush.bf16.msrb.mxu1 %v2623_v44 }
 0x2b1   :  { %1034 = vmatpush.bf16.msrb.mxu1 %v2622_v47 }
 0x2b8   :  { %760 = vmatmul.bf16.gmra.mxu3 %v2609_v39  ;;  %v611_v39 = vld [vmem:[#allocation2 + $0x30] sm:$0xff]  }
 0x2b9   :  { %v788_v40 = vunpack.c.l.bf16 %v611_v39  ;;  %v789_v42 = vunpack.c.h.bf16 %v611_v39 }
 0x2c8   :  { %765 = vmatmul.bf16.gmra.mxu3 %v2610_v41 }
 0x2d8   :  { %770 = vmatmul.bf16.gmra.mxu3 %v2611_v49  ;;  %v2621_v49 = vld [vmem:[%s3277_s4 + $0x48] sm:$0xff] }
 0x2d9   :  { %1035 = vmatpush.bf16.msrb.mxu1 %v2621_v49 }
 0x2dd   :  { %1036 = vmatpush.bf16.msrb.mxu1 %v2620_v51 }
 0x2eb   :  { %v736_v50 = vpop.f32.mrf.mxu3 }
 0x2ec   :  { %v792_v55 = vadd.f32 %v776_v52, %v736_v50  ;;  %v613_v50 = vld [vmem:[#allocation2 + $0x38] sm:$0xff]  }
 0x2ed   :  { %v790_v52 = vunpack.c.l.bf16 %v613_v50 }
 0x2f3   :  { %v738_v54 = vpop.f32.mrf.mxu3 }
 0x2f4   :  { %v793_v56 = vadd.f32 %v777_v53, %v738_v54  ;;  %v791_v53 = vunpack.c.h.bf16 %v613_v50 }
 0x2f6   :  { %v808_v57 = vpack.c.bf16 %v793_v56, %v792_v55 }
 0x2f8   :  { %894 = vmatmul.bf16.vlgmr.msrb.gmra.mxu0 %v808_v57 }
 0x2fb   :  { %v741_v58 = vpop.f32.mrf.mxu3 }
 0x2fc   :  { %v794_v63 = vadd.f32 %v778_v60, %v741_v58 }
 0x303   :  { %v743_v62 = vpop.f32.mrf.mxu3 }
 0x304   :  { %v795_v0 = vadd.f32 %v779_v61, %v743_v62 }
 0x306   :  { %v809_v1 = vpack.c.bf16 %v795_v0, %v794_v63 }
 0x308   :  { %899 = vmatmul.bf16.gmra.mxu0 %v809_v1 }
 0x30b   :  { %v746_v2 = vpop.f32.mrf.mxu3 }
 0x30c   :  { %v796_v7 = vadd.f32 %v780_v4, %v746_v2 }
 0x313   :  { %v748_v6 = vpop.f32.mrf.mxu3 }
 0x314   :  { %v797_v8 = vadd.f32 %v781_v5, %v748_v6 }
 0x316   :  { %v810_v9 = vpack.c.bf16 %v797_v8, %v796_v7 }
 0x318   :  { %904 = vmatmul.bf16.gmra.mxu0 %v810_v9 }
 0x31b   :  { %v751_v10 = vpop.f32.mrf.mxu3 }
 0x31c   :  { %v798_v15 = vadd.f32 %v782_v12, %v751_v10 }
 0x323   :  { %v753_v14 = vpop.f32.mrf.mxu3 }
 0x324   :  { %v799_v16 = vadd.f32 %v783_v13, %v753_v14 }
 0x326   :  { %v811_v17 = vpack.c.bf16 %v799_v16, %v798_v15 }
 0x328   :  { %909 = vmatmul.bf16.gmra.mxu0 %v811_v17 }
 0x32b   :  { %v756_v18 = vpop.f32.mrf.mxu3 }
 0x32c   :  { %v800_v23 = vadd.f32 %v784_v20, %v756_v18 }
 0x333   :  { %v758_v22 = vpop.f32.mrf.mxu3 }
 0x334   :  { %v801_v24 = vadd.f32 %v785_v21, %v758_v22 }
 0x336   :  { %v812_v25 = vpack.c.bf16 %v801_v24, %v800_v23 }
 0x338   :  { %914 = vmatmul.bf16.gmra.mxu0 %v812_v25 }
 0x33b   :  { %v761_v26 = vpop.f32.mrf.mxu3 }
 0x33c   :  { %v802_v32 = vadd.f32 %v786_v28, %v761_v26 }
 0x343   :  { %v763_v30 = vpop.f32.mrf.mxu3 }
 0x344   :  { %v803_v33 = vadd.f32 %v787_v29, %v763_v30 }
 0x346   :  { %v813_v34 = vpack.c.bf16 %v803_v33, %v802_v32 }
 0x348   :  { %919 = vmatmul.bf16.gmra.mxu0 %v813_v34 }
 0x34b   :  { %v766_v37 = vpop.f32.mrf.mxu3 }
 0x34c   :  { %v804_v41 = vadd.f32 %v788_v40, %v766_v37 }
 0x353   :  { %v768_v43 = vpop.f32.mrf.mxu3 }
 0x354   :  { %v805_v45 = vadd.f32 %v789_v42, %v768_v43 }
 0x356   :  { %v814_v46 = vpack.c.bf16 %v805_v45, %v804_v41 }
 0x358   :  { %924 = vmatmul.bf16.gmra.mxu0 %v814_v46 }
 0x35b   :  { %v771_v48 = vpop.f32.mrf.mxu3 }
 0x35c   :  { %v806_v55 = vadd.f32 %v790_v52, %v771_v48  ;;  %v2852_v52 = vld [vmem:[%s3278_s5 + $0x1] ss:$0 sm:$0xff] }
 0x363   :  { %v773_v54 = vpop.f32.mrf.mxu3 }
 0x364   :  { %v807_v56 = vadd.f32 %v791_v53, %v773_v54 }
 0x366   :  { %v815_v57 = vpack.c.bf16 %v807_v56, %v806_v55 }
 0x368   :  { %929 = vmatmul.bf16.gmra.mxu0 %v815_v57 }
 0x375   :  { %v895_v58 = vpop.f32.mrf.mxu0 }
 0x376   :  { %v896_v60 = vadd.f32 %v2851_v59, %v895_v58 }
 0x378   :  { %v935_v63 = vmax.f32 %v896_v60, 0.0 }
 0x37d   :  { %v897_v61 = vpop.f32.mrf.mxu0 }
 0x37e   :  { %v898_v62 = vadd.f32 %v2851_v59, %v897_v61 }
 0x380   :  { %v936_v0 = vmax.f32 %v898_v62, 0.0 }
 0x382   :  { %v951_v1 = vpack.c.bf16 %v936_v0, %v935_v63 }
 0x384   :  { %1037 = vmatmul.bf16.vlgmr.msrb.gmra.mxu1 %v951_v1 }
 0x385   :  { %v900_v2 = vpop.f32.mrf.mxu0 }
 0x386   :  { %v901_v3 = vadd.f32 %v2851_v59, %v900_v2 }
 0x388   :  { %v937_v6 = vmax.f32 %v901_v3, 0.0 }
 0x38d   :  { %v902_v4 = vpop.f32.mrf.mxu0 }
 0x38e   :  { %v903_v5 = vadd.f32 %v2851_v59, %v902_v4 }
 0x390   :  { %v938_v7 = vmax.f32 %v903_v5, 0.0 }
 0x392   :  { %v952_v8 = vpack.c.bf16 %v938_v7, %v937_v6 }
 0x394   :  { %1042 = vmatmul.bf16.gmra.mxu1 %v952_v8 }
 0x395   :  { %v905_v9 = vpop.f32.mrf.mxu0 }
 0x396   :  { %v906_v10 = vadd.f32 %v2851_v59, %v905_v9 }
 0x398   :  { %v939_v13 = vmax.f32 %v906_v10, 0.0 }
 0x39d   :  { %v907_v11 = vpop.f32.mrf.mxu0 }
 0x39e   :  { %v908_v12 = vadd.f32 %v2851_v59, %v907_v11 }
 0x3a0   :  { %v940_v14 = vmax.f32 %v908_v12, 0.0 }
 0x3a2   :  { %v953_v15 = vpack.c.bf16 %v940_v14, %v939_v13 }
 0x3a4   :  { %1047 = vmatmul.bf16.gmra.mxu1 %v953_v15 }
 0x3a5   :  { %v910_v16 = vpop.f32.mrf.mxu0 }
 0x3a6   :  { %v911_v17 = vadd.f32 %v2851_v59, %v910_v16 }
 0x3a8   :  { %v941_v20 = vmax.f32 %v911_v17, 0.0 }
 0x3ad   :  { %v912_v18 = vpop.f32.mrf.mxu0 }
 0x3ae   :  { %v913_v19 = vadd.f32 %v2851_v59, %v912_v18 }
 0x3b0   :  { %v942_v21 = vmax.f32 %v913_v19, 0.0 }
 0x3b2   :  { %v954_v22 = vpack.c.bf16 %v942_v21, %v941_v20 }
 0x3b4   :  { %1052 = vmatmul.bf16.gmra.mxu1 %v954_v22 }
 0x3b5   :  { %v915_v23 = vpop.f32.mrf.mxu0 }
 0x3b6   :  { %v916_v24 = vadd.f32 %v2851_v59, %v915_v23 }
 0x3b8   :  { %v943_v27 = vmax.f32 %v916_v24, 0.0 }
 0x3bd   :  { %v917_v25 = vpop.f32.mrf.mxu0 }
 0x3be   :  { %v918_v26 = vadd.f32 %v2851_v59, %v917_v25 }
 0x3c0   :  { %v944_v28 = vmax.f32 %v918_v26, 0.0 }
 0x3c2   :  { %v955_v29 = vpack.c.bf16 %v944_v28, %v943_v27 }
 0x3c4   :  { %1057 = vmatmul.bf16.gmra.mxu1 %v955_v29 }
 0x3c5   :  { %v920_v30 = vpop.f32.mrf.mxu0 }
 0x3c6   :  { %v921_v31 = vadd.f32 %v2851_v59, %v920_v30 }
 0x3c8   :  { %v945_v34 = vmax.f32 %v921_v31, 0.0 }
 0x3cd   :  { %v922_v32 = vpop.f32.mrf.mxu0 }
 0x3ce   :  { %v923_v33 = vadd.f32 %v2851_v59, %v922_v32 }
 0x3d0   :  { %v946_v35 = vmax.f32 %v923_v33, 0.0 }
 0x3d2   :  { %v956_v36 = vpack.c.bf16 %v946_v35, %v945_v34 }
 0x3d4   :  { %1062 = vmatmul.bf16.gmra.mxu1 %v956_v36 }
 0x3d5   :  { %v925_v37 = vpop.f32.mrf.mxu0 }
 0x3d6   :  { %v926_v38 = vadd.f32 %v2851_v59, %v925_v37 }
 0x3d8   :  { %v947_v42 = vmax.f32 %v926_v38, 0.0 }
 0x3dd   :  { %v927_v39 = vpop.f32.mrf.mxu0 }
 0x3de   :  { %v928_v40 = vadd.f32 %v2851_v59, %v927_v39 }
 0x3e0   :  { %v948_v43 = vmax.f32 %v928_v40, 0.0 }
 0x3e2   :  { %v957_v44 = vpack.c.bf16 %v948_v43, %v947_v42 }
 0x3e4   :  { %1067 = vmatmul.bf16.gmra.mxu1 %v957_v44 }
 0x3e5   :  { %v930_v41 = vpop.f32.mrf.mxu0 }
 0x3e6   :  { %v931_v45 = vadd.f32 %v2851_v59, %v930_v41 }
 0x3e8   :  { %v949_v48 = vmax.f32 %v931_v45, 0.0 }
 0x3ed   :  { %v932_v46 = vpop.f32.mrf.mxu0 }
 0x3ee   :  { %v933_v47 = vadd.f32 %v2851_v59, %v932_v46 }
 0x3f0   :  { %v950_v49 = vmax.f32 %v933_v47, 0.0 }
 0x3f2   :  { %v958_v50 = vpack.c.bf16 %v950_v49, %v949_v48 }
 0x3f4   :  { %1072 = vmatmul.bf16.gmra.mxu1 %v958_v50 }
 0x401   :  { %v1038_v51 = vpop.f32.mrf.mxu1 }
 0x402   :  { %v1039_v53 = vadd.f32 %v2852_v52, %v1038_v51 }
 0x404   :  { %v1078_v56 = vmax.f32 %v1039_v53, 0.0  ;;  %v2637_v53 = vld [vmem:[%s3274_s0 + $0x8] sm:$0xff] }
 0x409   :  { %v1040_v54 = vpop.f32.mrf.mxu1 }
 0x40a   :  { %v1041_v55 = vadd.f32 %v2852_v52, %v1040_v54  ;;  %v2638_v54 = vld [vmem:[%s3274_s0 + $0x10] sm:$0xff] }
 0x40c   :  { %v1079_v57 = vmax.f32 %v1041_v55, 0.0  ;;  %v2639_v55 = vld [vmem:[%s3274_s0 + $0x18] sm:$0xff] }
 0x40e   :  { %v2735_v58 = vpack.c.bf16 %v1079_v57, %v1078_v56  ;;  %v2640_v56 = vld [vmem:[%s3274_s0 + $0x20] sm:$0xff]  ;;  %v2641_v57 = vld [vmem:[%s3274_s0 + $0x28] sm:$0xff] }
 0x410   :  { %2736 = vst [vmem:[#allocation2] sm:$0xff] %v2735_v58   ;;  %v2651_v58 = vld [vmem:[%s3275_s2 + $0xb8] sm:$0xff] }
 0x411   :  { %v1043_v60 = vpop.f32.mrf.mxu1  ;;  %1413 = vmatpush.bf16.msra.mxu3 %v2651_v58 }
 0x412   :  { %v1044_v61 = vadd.f32 %v2852_v52, %v1043_v60  ;;  %v2650_v60 = vld [vmem:[%s3275_s2 + $0xb0] sm:$0xff] }
 0x414   :  { %v1080_v63 = vmax.f32 %v1044_v61, 0.0  ;;  %v2649_v61 = vld [vmem:[%s3275_s2 + $0xa8] sm:$0xff] }
 0x415   :  { %1414 = vmatpush.bf16.msra.mxu3 %v2650_v60  ;;  %v2656_v60 = vld [vmem:[%s3277_s4 + $0xa0] sm:$0xff] }
 0x417   :  { %v2628_v51 = vld [vmem:[#allocation2] sm:$0xff] }
 0x419   :  { %v1045_v62 = vpop.f32.mrf.mxu1  ;;  %1415 = vmatpush.bf16.msra.mxu3 %v2649_v61 }
 0x41a   :  { %v1046_v59 = vadd.f32 %v2852_v52, %v1045_v62  ;;  %v2648_v62 = vld [vmem:[%s3275_s2 + $0xa0] sm:$0xff] }
 0x41c   :  { %v1081_v0 = vmax.f32 %v1046_v59, 0.0  ;;  %v2642_v59 = vld [vmem:[%s3274_s0 + $0x30] sm:$0xff] }
 0x41d   :  { %1416 = vmatpush.bf16.msra.mxu3 %v2648_v62 }
 0x41e   :  { %v2740_v1 = vpack.c.bf16 %v1081_v0, %v1080_v63  ;;  %v2647_v63 = vld [vmem:[%s3275_s2 + $0x98] sm:$0xff]  ;;  %v2646_v0 = vld [vmem:[%s3275_s2 + $0x90] sm:$0xff] }
 0x420   :  { %2819 = vst [vmem:[#allocation2 + $0x8] sm:$0xff] %v2740_v1   ;;  %v2645_v1 = vld [vmem:[%s3275_s2 + $0x88] sm:$0xff] }
 0x421   :  { %v1048_v2 = vpop.f32.mrf.mxu1  ;;  %1417 = vmatpush.bf16.msra.mxu3 %v2647_v63 }
 0x422   :  { %v1049_v3 = vadd.f32 %v2852_v52, %v1048_v2  ;;  %v2644_v2 = vld [vmem:[%s3275_s2 + $0x80] sm:$0xff] }
 0x424   :  { %v1082_v6 = vmax.f32 %v1049_v3, 0.0  ;;  %v2643_v3 = vld [vmem:[%s3274_s0 + $0x38] sm:$0xff] }
 0x425   :  { %1418 = vmatpush.bf16.msra.mxu3 %v2646_v0  ;;  %v2655_v0 = vld [vmem:[%s3277_s4 + $0x98] sm:$0xff] }
 0x427   :  { %v2629_v50 = vld [vmem:[#allocation2 + $0x8] sm:$0xff] }
 0x429   :  { %v1050_v4 = vpop.f32.mrf.mxu1  ;;  %1419 = vmatpush.bf16.msra.mxu3 %v2645_v1 }
 0x42a   :  { %v1051_v5 = vadd.f32 %v2852_v52, %v1050_v4 }
 0x42c   :  { %v1083_v7 = vmax.f32 %v1051_v5, 0.0  ;;  %v1126_v5 = vld [vmem:[#allocation2] sm:$0xff]  }
 0x42d   :  { %1420 = vmatpush.bf16.msra.mxu3 %v2644_v2  ;;  %v2654_v2 = vld [vmem:[%s3277_s4 + $0x90] sm:$0xff] }
 0x42e   :  { %v2745_v8 = vpack.c.bf16 %v1083_v7, %v1082_v6  ;;  %v1303_v6 = vunpack.c.l.bf16 %v1126_v5  ;;  %v1304_v7 = vunpack.c.h.bf16 %v1126_v5 }
 0x430   :  { %2820 = vst [vmem:[#allocation2 + $0x10] sm:$0xff] %v2745_v8  }
 0x431   :  { %v1053_v9 = vpop.f32.mrf.mxu1 }
 0x432   :  { %v1054_v10 = vadd.f32 %v2852_v52, %v1053_v9 }
 0x434   :  { %v1084_v13 = vmax.f32 %v1054_v10, 0.0 }
 0x437   :  { %v2630_v49 = vld [vmem:[#allocation2 + $0x10] sm:$0xff] }
 0x439   :  { %v1055_v11 = vpop.f32.mrf.mxu1 }
 0x43a   :  { %v1056_v12 = vadd.f32 %v2852_v52, %v1055_v11 }
 0x43c   :  { %v1085_v14 = vmax.f32 %v1056_v12, 0.0 }
 0x43e   :  { %v2750_v15 = vpack.c.bf16 %v1085_v14, %v1084_v13  ;;  %v1128_v13 = vld [vmem:[#allocation2 + $0x8] sm:$0xff]  }
 0x43f   :  { %v1305_v14 = vunpack.c.l.bf16 %v1128_v13 }
 0x440   :  { %2821 = vst [vmem:[#allocation2 + $0x18] sm:$0xff] %v2750_v15   ;;  %v1306_v15 = vunpack.c.h.bf16 %v1128_v13  ;;  %v2853_v13 = vld [vmem:[%s3276_s3 + $0x2] ss:$0 sm:$0xff] }
 0x441   :  { %v1058_v16 = vpop.f32.mrf.mxu1 }
 0x442   :  { %v1059_v17 = vadd.f32 %v2852_v52, %v1058_v16 }
 0x444   :  { %v1086_v20 = vmax.f32 %v1059_v17, 0.0 }
 0x447   :  { %v2631_v48 = vld [vmem:[#allocation2 + $0x18] sm:$0xff] }
 0x449   :  { %v1060_v18 = vpop.f32.mrf.mxu1 }
 0x44a   :  { %v1061_v19 = vadd.f32 %v2852_v52, %v1060_v18 }
 0x44c   :  { %v1087_v21 = vmax.f32 %v1061_v19, 0.0 }
 0x44e   :  { %v2755_v22 = vpack.c.bf16 %v1087_v21, %v1086_v20  ;;  %v1130_v21 = vld [vmem:[#allocation2 + $0x10] sm:$0xff]  }
 0x450   :  { %2822 = vst [vmem:[#allocation2 + $0x20] sm:$0xff] %v2755_v22   ;;  %v1307_v22 = vunpack.c.l.bf16 %v1130_v21 }
 0x451   :  { %v1063_v23 = vpop.f32.mrf.mxu1 }
 0x452   :  { %v1064_v24 = vadd.f32 %v2852_v52, %v1063_v23  ;;  %v1308_v23 = vunpack.c.h.bf16 %v1130_v21 }
 0x454   :  { %v1088_v27 = vmax.f32 %v1064_v24, 0.0 }
 0x457   :  { %v2632_v47 = vld [vmem:[#allocation2 + $0x20] sm:$0xff] }
 0x459   :  { %v1065_v25 = vpop.f32.mrf.mxu1 }
 0x45a   :  { %v1066_v26 = vadd.f32 %v2852_v52, %v1065_v25 }
 0x45c   :  { %v1089_v28 = vmax.f32 %v1066_v26, 0.0 }
 0x45e   :  { %v2760_v29 = vpack.c.bf16 %v1089_v28, %v1088_v27 }
 0x460   :  { %2823 = vst [vmem:[#allocation2 + $0x28] sm:$0xff] %v2760_v29   ;;  %v1132_v29 = vld [vmem:[#allocation2 + $0x18] sm:$0xff]  }
 0x461   :  { %v1068_v30 = vpop.f32.mrf.mxu1 }
 0x462   :  { %v1069_v31 = vadd.f32 %v2852_v52, %v1068_v30  ;;  %v1309_v30 = vunpack.c.l.bf16 %v1132_v29 }
 0x464   :  { %v1090_v34 = vmax.f32 %v1069_v31, 0.0  ;;  %v1310_v31 = vunpack.c.h.bf16 %v1132_v29 }
 0x467   :  { %v2633_v46 = vld [vmem:[#allocation2 + $0x28] sm:$0xff] }
 0x469   :  { %v1070_v32 = vpop.f32.mrf.mxu1 }
 0x46a   :  { %v1071_v33 = vadd.f32 %v2852_v52, %v1070_v32 }
 0x46c   :  { %v1091_v35 = vmax.f32 %v1071_v33, 0.0 }
 0x46e   :  { %v2765_v36 = vpack.c.bf16 %v1091_v35, %v1090_v34 }
 0x470   :  { %2824 = vst [vmem:[#allocation2 + $0x30] sm:$0xff] %v2765_v36  }
 0x471   :  { %v1073_v37 = vpop.f32.mrf.mxu1 }
 0x472   :  { %v1074_v38 = vadd.f32 %v2852_v52, %v1073_v37  ;;  %v1134_v37 = vld [vmem:[#allocation2 + $0x20] sm:$0xff]  }
 0x474   :  { %v1092_v42 = vmax.f32 %v1074_v38, 0.0  ;;  %v1311_v38 = vunpack.c.l.bf16 %v1134_v37 }
 0x477   :  { %v2634_v45 = vld [vmem:[#allocation2 + $0x30] sm:$0xff] }
 0x479   :  { %v1075_v39 = vpop.f32.mrf.mxu1 }
 0x47a   :  { %v1076_v40 = vadd.f32 %v2852_v52, %v1075_v39  ;;  %v2636_v52 = vld [vmem:[%s3274_s0] sm:$0xff]  ;;  %v1312_v39 = vunpack.c.h.bf16 %v1134_v37 }
 0x47c   :  { %v1093_v43 = vmax.f32 %v1076_v40, 0.0 }
 0x47e   :  { %v2770_v44 = vpack.c.bf16 %v1093_v43, %v1092_v42 }
 0x480   :  { %2825 = vst [vmem:[#allocation2 + $0x38] sm:$0xff] %v2770_v44  }
 0x487   :  { %v2635_v41 = vld [vmem:[#allocation2 + $0x38] sm:$0xff] }
 0x488   :  { %1254 = vmatpush.bf16.msra.mxu2 %v2635_v41 }
 0x48c   :  { %1255 = vmatpush.bf16.msra.mxu2 %v2634_v45  ;;  %v1136_v45 = vld [vmem:[#allocation2 + $0x28] sm:$0xff]  }
 0x490   :  { %1256 = vmatpush.bf16.msra.mxu2 %v2633_v46  ;;  %v1313_v46 = vunpack.c.l.bf16 %v1136_v45 }
 0x494   :  { %1257 = vmatpush.bf16.msra.mxu2 %v2632_v47  ;;  %v1314_v47 = vunpack.c.h.bf16 %v1136_v45 }
 0x498   :  { %1258 = vmatpush.bf16.msra.mxu2 %v2631_v48 }
 0x49c   :  { %1259 = vmatpush.bf16.msra.mxu2 %v2630_v49 }
 0x4a0   :  { %1260 = vmatpush.bf16.msra.mxu2 %v2629_v50 }
 0x4a4   :  { %1261 = vmatpush.bf16.msra.mxu2 %v2628_v51 }
 0x4a7   :  { %1262 = vmatmul.bf16.vlgmr.msra.gmra.mxu2 %v2636_v52  ;;  %v2659_v52 = vld [vmem:[%s3277_s4 + $0xb8] sm:$0xff] }
 0x4a8   :  { %1556 = vmatpush.bf16.msra.mxu0 %v2659_v52 }
 0x4b7   :  { %1267 = vmatmul.bf16.gmra.mxu2 %v2637_v53  ;;  %v2658_v53 = vld [vmem:[%s3277_s4 + $0xb0] sm:$0xff] }
 0x4b8   :  { %1557 = vmatpush.bf16.msra.mxu0 %v2658_v53 }
 0x4c7   :  { %1272 = vmatmul.bf16.gmra.mxu2 %v2638_v54 }
 0x4d7   :  { %1277 = vmatmul.bf16.gmra.mxu2 %v2639_v55  ;;  %v2657_v55 = vld [vmem:[%s3277_s4 + $0xa8] sm:$0xff] }
 0x4d8   :  { %1558 = vmatpush.bf16.msra.mxu0 %v2657_v55 }
 0x4dc   :  { %1559 = vmatpush.bf16.msra.mxu0 %v2656_v60 }
 0x4e0   :  { %1560 = vmatpush.bf16.msra.mxu0 %v2655_v0 }
 0x4e4   :  { %1561 = vmatpush.bf16.msra.mxu0 %v2654_v2 }
 0x4e7   :  { %1282 = vmatmul.bf16.gmra.mxu2 %v2640_v56  ;;  %v1138_v56 = vld [vmem:[#allocation2 + $0x30] sm:$0xff]  }
 0x4e8   :  { %v1316_v58 = vunpack.c.h.bf16 %v1138_v56 }
 0x4f7   :  { %1287 = vmatmul.bf16.gmra.mxu2 %v2641_v57  ;;  %v1315_v57 = vunpack.c.l.bf16 %v1138_v56 }
 0x507   :  { %1292 = vmatmul.bf16.gmra.mxu2 %v2642_v59 }
 0x517   :  { %1297 = vmatmul.bf16.gmra.mxu2 %v2643_v3  ;;  %v1140_v3 = vld [vmem:[#allocation2 + $0x38] sm:$0xff]  }
 0x518   :  { %v1317_v5 = vunpack.c.l.bf16 %v1140_v3 }
 0x52a   :  { %v1263_v4 = vpop.f32.mrf.mxu2 }
 0x52b   :  { %v1319_v9 = vadd.f32 %v1303_v6, %v1263_v4  ;;  %v2653_v4 = vld [vmem:[%s3277_s4 + $0x88] sm:$0xff]  ;;  %v1318_v6 = vunpack.c.h.bf16 %v1140_v3 }
 0x52c   :  { %1562 = vmatpush.bf16.msra.mxu0 %v2653_v4 }
 0x532   :  { %v1265_v8 = vpop.f32.mrf.mxu2 }
 0x533   :  { %v1320_v10 = vadd.f32 %v1304_v7, %v1265_v8 }
 0x535   :  { %v1335_v11 = vpack.c.bf16 %v1320_v10, %v1319_v9  ;;  %v2652_v10 = vld [vmem:[%s3277_s4 + $0x80] sm:$0xff] }
 0x536   :  { %1563 = vmatpush.bf16.msra.mxu0 %v2652_v10 }
 0x537   :  { %1421 = vmatmul.bf16.vlgmr.msra.gmra.mxu3 %v1335_v11 }
 0x53a   :  { %v1268_v12 = vpop.f32.mrf.mxu2 }
 0x53b   :  { %v1321_v17 = vadd.f32 %v1305_v14, %v1268_v12 }
 0x542   :  { %v1270_v16 = vpop.f32.mrf.mxu2 }
 0x543   :  { %v1322_v18 = vadd.f32 %v1306_v15, %v1270_v16 }
 0x545   :  { %v1336_v19 = vpack.c.bf16 %v1322_v18, %v1321_v17 }
 0x547   :  { %1426 = vmatmul.bf16.gmra.mxu3 %v1336_v19 }
 0x54a   :  { %v1273_v20 = vpop.f32.mrf.mxu2 }
 0x54b   :  { %v1323_v25 = vadd.f32 %v1307_v22, %v1273_v20 }
 0x552   :  { %v1275_v24 = vpop.f32.mrf.mxu2 }
 0x553   :  { %v1324_v26 = vadd.f32 %v1308_v23, %v1275_v24 }
 0x555   :  { %v1337_v27 = vpack.c.bf16 %v1324_v26, %v1323_v25 }
 0x557   :  { %1431 = vmatmul.bf16.gmra.mxu3 %v1337_v27 }
 0x55a   :  { %v1278_v28 = vpop.f32.mrf.mxu2 }
 0x55b   :  { %v1325_v33 = vadd.f32 %v1309_v30, %v1278_v28 }
 0x562   :  { %v1280_v32 = vpop.f32.mrf.mxu2 }
 0x563   :  { %v1326_v34 = vadd.f32 %v1310_v31, %v1280_v32 }
 0x565   :  { %v1338_v35 = vpack.c.bf16 %v1326_v34, %v1325_v33 }
 0x567   :  { %1436 = vmatmul.bf16.gmra.mxu3 %v1338_v35 }
 0x56a   :  { %v1283_v36 = vpop.f32.mrf.mxu2 }
 0x56b   :  { %v1327_v42 = vadd.f32 %v1311_v38, %v1283_v36 }
 0x572   :  { %v1285_v40 = vpop.f32.mrf.mxu2 }
 0x573   :  { %v1328_v43 = vadd.f32 %v1312_v39, %v1285_v40 }
 0x575   :  { %v1339_v44 = vpack.c.bf16 %v1328_v43, %v1327_v42 }
 0x577   :  { %1441 = vmatmul.bf16.gmra.mxu3 %v1339_v44 }
 0x57a   :  { %v1288_v41 = vpop.f32.mrf.mxu2 }
 0x57b   :  { %v1329_v49 = vadd.f32 %v1313_v46, %v1288_v41 }
 0x582   :  { %v1290_v48 = vpop.f32.mrf.mxu2 }
 0x583   :  { %v1330_v50 = vadd.f32 %v1314_v47, %v1290_v48 }
 0x585   :  { %v1340_v51 = vpack.c.bf16 %v1330_v50, %v1329_v49 }
 0x587   :  { %1446 = vmatmul.bf16.gmra.mxu3 %v1340_v51 }
 0x58a   :  { %v1293_v54 = vpop.f32.mrf.mxu2 }
 0x58b   :  { %v1331_v62 = vadd.f32 %v1315_v57, %v1293_v54 }
 0x592   :  { %v1295_v61 = vpop.f32.mrf.mxu2 }
 0x593   :  { %v1332_v59 = vadd.f32 %v1316_v58, %v1295_v61 }
 0x595   :  { %v1341_v63 = vpack.c.bf16 %v1332_v59, %v1331_v62 }
 0x597   :  { %1451 = vmatmul.bf16.gmra.mxu3 %v1341_v63 }
 0x59a   :  { %v1298_v1 = vpop.f32.mrf.mxu2 }
 0x59b   :  { %v1333_v8 = vadd.f32 %v1317_v5, %v1298_v1 }
 0x5a2   :  { %v1300_v7 = vpop.f32.mrf.mxu2 }
 0x5a3   :  { %v1334_v9 = vadd.f32 %v1318_v6, %v1300_v7  ;;  %v2854_v6 = vld [vmem:[%s3278_s5 + $0x2] ss:$0 sm:$0xff] }
 0x5a5   :  { %v1342_v11 = vpack.c.bf16 %v1334_v9, %v1333_v8 }
 0x5a7   :  { %1456 = vmatmul.bf16.gmra.mxu3 %v1342_v11 }
 0x5ba   :  { %v1422_v12 = vpop.f32.mrf.mxu3 }
 0x5bb   :  { %v1423_v14 = vadd.f32 %v2853_v13, %v1422_v12 }
 0x5bd   :  { %v1462_v17 = vmax.f32 %v1423_v14, 0.0 }
 0x5c2   :  { %v1424_v15 = vpop.f32.mrf.mxu3 }
 0x5c3   :  { %v1425_v16 = vadd.f32 %v2853_v13, %v1424_v15 }
 0x5c5   :  { %v1463_v18 = vmax.f32 %v1425_v16, 0.0 }
 0x5c7   :  { %v1478_v19 = vpack.c.bf16 %v1463_v18, %v1462_v17 }
 0x5c9   :  { %1564 = vmatmul.bf16.vlgmr.msra.gmra.mxu0 %v1478_v19 }
 0x5ca   :  { %v1427_v20 = vpop.f32.mrf.mxu3 }
 0x5cb   :  { %v1428_v21 = vadd.f32 %v2853_v13, %v1427_v20 }
 0x5cd   :  { %v1464_v24 = vmax.f32 %v1428_v21, 0.0 }
 0x5d2   :  { %v1429_v22 = vpop.f32.mrf.mxu3 }
 0x5d3   :  { %v1430_v23 = vadd.f32 %v2853_v13, %v1429_v22 }
 0x5d5   :  { %v1465_v25 = vmax.f32 %v1430_v23, 0.0 }
 0x5d7   :  { %v1479_v26 = vpack.c.bf16 %v1465_v25, %v1464_v24 }
 0x5d9   :  { %1569 = vmatmul.bf16.gmra.mxu0 %v1479_v26 }
 0x5da   :  { %v1432_v27 = vpop.f32.mrf.mxu3 }
 0x5db   :  { %v1433_v28 = vadd.f32 %v2853_v13, %v1432_v27 }
 0x5dd   :  { %v1466_v31 = vmax.f32 %v1433_v28, 0.0 }
 0x5e2   :  { %v1434_v29 = vpop.f32.mrf.mxu3 }
 0x5e3   :  { %v1435_v30 = vadd.f32 %v2853_v13, %v1434_v29 }
 0x5e5   :  { %v1467_v32 = vmax.f32 %v1435_v30, 0.0 }
 0x5e7   :  { %v1480_v33 = vpack.c.bf16 %v1467_v32, %v1466_v31 }
 0x5e9   :  { %1574 = vmatmul.bf16.gmra.mxu0 %v1480_v33 }
 0x5ea   :  { %v1437_v34 = vpop.f32.mrf.mxu3 }
 0x5eb   :  { %v1438_v35 = vadd.f32 %v2853_v13, %v1437_v34 }
 0x5ed   :  { %v1468_v38 = vmax.f32 %v1438_v35, 0.0 }
 0x5f2   :  { %v1439_v36 = vpop.f32.mrf.mxu3 }
 0x5f3   :  { %v1440_v37 = vadd.f32 %v2853_v13, %v1439_v36 }
 0x5f5   :  { %v1469_v39 = vmax.f32 %v1440_v37, 0.0 }
 0x5f7   :  { %v1481_v40 = vpack.c.bf16 %v1469_v39, %v1468_v38 }
 0x5f9   :  { %1579 = vmatmul.bf16.gmra.mxu0 %v1481_v40 }
 0x5fa   :  { %v1442_v42 = vpop.f32.mrf.mxu3 }
 0x5fb   :  { %v1443_v43 = vadd.f32 %v2853_v13, %v1442_v42 }
 0x5fd   :  { %v1470_v45 = vmax.f32 %v1443_v43, 0.0 }
 0x602   :  { %v1444_v44 = vpop.f32.mrf.mxu3 }
 0x603   :  { %v1445_v41 = vadd.f32 %v2853_v13, %v1444_v44 }
 0x605   :  { %v1471_v46 = vmax.f32 %v1445_v41, 0.0 }
 0x607   :  { %v1482_v47 = vpack.c.bf16 %v1471_v46, %v1470_v45 }
 0x609   :  { %1584 = vmatmul.bf16.gmra.mxu0 %v1482_v47 }
 0x60a   :  { %v1447_v48 = vpop.f32.mrf.mxu3 }
 0x60b   :  { %v1448_v49 = vadd.f32 %v2853_v13, %v1447_v48 }
 0x60d   :  { %v1472_v52 = vmax.f32 %v1448_v49, 0.0 }
 0x612   :  { %v1449_v50 = vpop.f32.mrf.mxu3 }
 0x613   :  { %v1450_v51 = vadd.f32 %v2853_v13, %v1449_v50 }
 0x615   :  { %v1473_v53 = vmax.f32 %v1450_v51, 0.0 }
 0x617   :  { %v1483_v54 = vpack.c.bf16 %v1473_v53, %v1472_v52 }
 0x619   :  { %1589 = vmatmul.bf16.gmra.mxu0 %v1483_v54 }
 0x61a   :  { %v1452_v55 = vpop.f32.mrf.mxu3 }
 0x61b   :  { %v1453_v56 = vadd.f32 %v2853_v13, %v1452_v55 }
 0x61d   :  { %v1474_v60 = vmax.f32 %v1453_v56, 0.0 }
 0x622   :  { %v1454_v57 = vpop.f32.mrf.mxu3 }
 0x623   :  { %v1455_v58 = vadd.f32 %v2853_v13, %v1454_v57 }
 0x625   :  { %v1475_v61 = vmax.f32 %v1455_v58, 0.0 }
 0x627   :  { %v1484_v62 = vpack.c.bf16 %v1475_v61, %v1474_v60 }
 0x629   :  { %1594 = vmatmul.bf16.gmra.mxu0 %v1484_v62 }
 0x62a   :  { %v1457_v59 = vpop.f32.mrf.mxu3 }
 0x62b   :  { %v1458_v63 = vadd.f32 %v2853_v13, %v1457_v59 }
 0x62d   :  { %v1476_v2 = vmax.f32 %v1458_v63, 0.0  ;;  %v2675_v63 = vld [vmem:[%s3279_s7 + $0x38] sm:$0xff] }
 0x62e   :  { %1800 = vmatpush.bf16.msrb.mxu2 %v2675_v63 }
 0x632   :  { %v1459_v0 = vpop.f32.mrf.mxu3 }
 0x633   :  { %v1460_v1 = vadd.f32 %v2853_v13, %v1459_v0  ;;  %v2674_v0 = vld [vmem:[%s3279_s7 + $0x30] sm:$0xff] }
 0x634   :  { %1801 = vmatpush.bf16.msrb.mxu2 %v2674_v0 }
 0x635   :  { %v1477_v3 = vmax.f32 %v1460_v1, 0.0 }
 0x637   :  { %v1485_v4 = vpack.c.bf16 %v1477_v3, %v1476_v2  ;;  %v2673_v2 = vld [vmem:[%s3279_s7 + $0x28] sm:$0xff] }
 0x638   :  { %1802 = vmatpush.bf16.msrb.mxu2 %v2673_v2 }
 0x639   :  { %1599 = vmatmul.bf16.gmra.mxu0 %v1485_v4  ;;  %v2672_v4 = vld [vmem:[%s3279_s7 + $0x20] sm:$0xff] }
 0x63c   :  { %1803 = vmatpush.bf16.msrb.mxu2 %v2672_v4 }
 0x646   :  { %v1565_v5 = vpop.f32.mrf.mxu0 }
 0x647   :  { %v1566_v7 = vadd.f32 %v2854_v6, %v1565_v5 }
 0x649   :  { %v1605_v10 = vmax.f32 %v1566_v7, 0.0 }
 0x64e   :  { %v1567_v8 = vpop.f32.mrf.mxu0 }
 0x64f   :  { %v1568_v9 = vadd.f32 %v2854_v6, %v1567_v8  ;;  %v2670_v8 = vld [vmem:[%s3279_s7 + $0x10] sm:$0xff] }
 0x651   :  { %v1606_v11 = vmax.f32 %v1568_v9, 0.0 }
 0x653   :  { %v2775_v12 = vpack.c.bf16 %v1606_v11, %v1605_v10  ;;  %v2669_v10 = vld [vmem:[%s3279_s7 + $0x8] sm:$0xff] }
 0x655   :  { %2776 = vst [vmem:[#allocation2] sm:$0xff] %v2775_v12   ;;  %v2668_v12 = vld [vmem:[%s3279_s7] sm:$0xff] }
 0x656   :  { %v1570_v14 = vpop.f32.mrf.mxu0 }
 0x657   :  { %v1571_v15 = vadd.f32 %v2854_v6, %v1570_v14 }
 0x659   :  { %v1607_v17 = vmax.f32 %v1571_v15, 0.0  ;;  %v1653_v15 = vld [vmem:[%s3280_s6] sm:$0xf] }
 0x65c   :  { %v2660_v14 = vld [vmem:[#allocation2] sm:$0xff] }
 0x65e   :  { %v1572_v16 = vpop.f32.mrf.mxu0 }
 0x65f   :  { %v1573_v13 = vadd.f32 %v2854_v6, %v1572_v16  ;;  %v2683_v16 = vld [vmem:[%s3282_s9 + $0x38] sm:$0xff] }
 0x660   :  { %1883 = vmatpush.bf16.msrb.mxu3 %v2683_v16 }
 0x661   :  { %v1608_v18 = vmax.f32 %v1573_v13, 0.0  ;;  %v2682_v13 = vld [vmem:[%s3282_s9 + $0x30] sm:$0xff] }
 0x663   :  { %v2780_v19 = vpack.c.bf16 %v1608_v18, %v1607_v17  ;;  %v2681_v17 = vld [vmem:[%s3282_s9 + $0x28] sm:$0xff]  ;;  %v2680_v18 = vld [vmem:[%s3282_s9 + $0x20] sm:$0xff] }
 0x664   :  { %1884 = vmatpush.bf16.msrb.mxu3 %v2682_v13 }
 0x665   :  { %2826 = vst [vmem:[#allocation2 + $0x8] sm:$0xff] %v2780_v19   ;;  %v2679_v19 = vld [vmem:[%s3282_s9 + $0x18] sm:$0xff] }
 0x666   :  { %v1575_v20 = vpop.f32.mrf.mxu0 }
 0x667   :  { %v1576_v21 = vadd.f32 %v2854_v6, %v1575_v20  ;;  %v2678_v20 = vld [vmem:[%s3282_s9 + $0x10] sm:$0xff] }
 0x668   :  { %1885 = vmatpush.bf16.msrb.mxu3 %v2681_v17 }
 0x669   :  { %v1609_v24 = vmax.f32 %v1576_v21, 0.0  ;;  %v2677_v21 = vld [vmem:[%s3282_s9 + $0x8] sm:$0xff] }
 0x66c   :  { %v2661_v11 = vld [vmem:[#allocation2 + $0x8] sm:$0xff]  ;;  %1886 = vmatpush.bf16.msrb.mxu3 %v2680_v18 }
 0x66e   :  { %v1577_v22 = vpop.f32.mrf.mxu0 }
 0x66f   :  { %v1578_v23 = vadd.f32 %v2854_v6, %v1577_v22 }
 0x670   :  { %1887 = vmatpush.bf16.msrb.mxu3 %v2679_v19 }
 0x671   :  { %v1610_v25 = vmax.f32 %v1578_v23, 0.0 }
 0x673   :  { %v2785_v26 = vpack.c.bf16 %v1610_v25, %v1609_v24  ;;  %v2676_v24 = vld [vmem:[%s3282_s9] sm:$0xff] }
 0x674   :  { %1888 = vmatpush.bf16.msrb.mxu3 %v2678_v20 }
 0x675   :  { %2827 = vst [vmem:[#allocation2 + $0x10] sm:$0xff] %v2785_v26   ;;  %v2691_v26 = vld [vmem:[%s3284_s11 + $0x38] sm:$0xff] }
 0x676   :  { %v1580_v27 = vpop.f32.mrf.mxu0 }
 0x677   :  { %v1581_v28 = vadd.f32 %v2854_v6, %v1580_v27  ;;  %v2690_v27 = vld [vmem:[%s3284_s11 + $0x30] sm:$0xff] }
 0x678   :  { %1889 = vmatpush.bf16.msrb.mxu3 %v2677_v21 }
 0x679   :  { %v1611_v31 = vmax.f32 %v1581_v28, 0.0  ;;  %v2689_v28 = vld [vmem:[%s3284_s11 + $0x28] sm:$0xff] }
 0x67c   :  { %v2662_v9 = vld [vmem:[#allocation2 + $0x10] sm:$0xff]  ;;  %1890 = vmatpush.bf16.msrb.mxu3 %v2676_v24 }
 0x67e   :  { %v1582_v29 = vpop.f32.mrf.mxu0 }
 0x67f   :  { %v1583_v30 = vadd.f32 %v2854_v6, %v1582_v29  ;;  %v2688_v29 = vld [vmem:[%s3284_s11 + $0x20] sm:$0xff] }
 0x681   :  { %v1612_v32 = vmax.f32 %v1583_v30, 0.0  ;;  %v2687_v30 = vld [vmem:[%s3284_s11 + $0x18] sm:$0xff] }
 0x683   :  { %v2790_v33 = vpack.c.bf16 %v1612_v32, %v1611_v31  ;;  %v2686_v31 = vld [vmem:[%s3284_s11 + $0x10] sm:$0xff]  ;;  %v2855_v32 = vld [vmem:[%s3281_s8] ss:$0 sm:$0xff] }
 0x685   :  { %2828 = vst [vmem:[#allocation2 + $0x18] sm:$0xff] %v2790_v33  }
 0x686   :  { %v1585_v34 = vpop.f32.mrf.mxu0 }
 0x687   :  { %v1586_v35 = vadd.f32 %v2854_v6, %v1585_v34 }
 0x689   :  { %v1613_v38 = vmax.f32 %v1586_v35, 0.0 }
 0x68c   :  { %v2663_v7 = vld [vmem:[#allocation2 + $0x18] sm:$0xff] }
 0x68e   :  { %v1587_v36 = vpop.f32.mrf.mxu0 }
 0x68f   :  { %v1588_v37 = vadd.f32 %v2854_v6, %v1587_v36 }
 0x691   :  { %v1614_v39 = vmax.f32 %v1588_v37, 0.0 }
 0x693   :  { %v2795_v40 = vpack.c.bf16 %v1614_v39, %v1613_v38  ;;  %v2685_v38 = vld [vmem:[%s3284_s11 + $0x8] sm:$0xff]  ;;  %v2684_v39 = vld [vmem:[%s3284_s11] sm:$0xff] }
 0x695   :  { %2829 = vst [vmem:[#allocation2 + $0x20] sm:$0xff] %v2795_v40   ;;  %v2856_v40 = vld [vmem:[%s3283_s10] ss:$0 sm:$0xff] }
 0x696   :  { %v1590_v42 = vpop.f32.mrf.mxu0 }
 0x697   :  { %v1591_v43 = vadd.f32 %v2854_v6, %v1590_v42 }
 0x699   :  { %v1615_v45 = vmax.f32 %v1591_v43, 0.0 }
 0x69c   :  { %v2664_v5 = vld [vmem:[#allocation2 + $0x20] sm:$0xff] }
 0x69e   :  { %v1592_v44 = vpop.f32.mrf.mxu0 }
 0x69f   :  { %v1593_v41 = vadd.f32 %v2854_v6, %v1592_v44 }
 0x6a1   :  { %v1616_v46 = vmax.f32 %v1593_v41, 0.0 }
 0x6a3   :  { %v2800_v47 = vpack.c.bf16 %v1616_v46, %v1615_v45  ;;  %v2857_v46 = vld [vmem:[%s3285_s12] ss:$0 sm:$0xff] }
 0x6a5   :  { %2830 = vst [vmem:[#allocation2 + $0x28] sm:$0xff] %v2800_v47  }
 0x6a6   :  { %v1595_v48 = vpop.f32.mrf.mxu0 }
 0x6a7   :  { %v1596_v49 = vadd.f32 %v2854_v6, %v1595_v48 }
 0x6a9   :  { %v1617_v52 = vmax.f32 %v1596_v49, 0.0 }
 0x6ac   :  { %v2665_v3 = vld [vmem:[#allocation2 + $0x28] sm:$0xff] }
 0x6ae   :  { %v1597_v50 = vpop.f32.mrf.mxu0 }
 0x6af   :  { %v1598_v51 = vadd.f32 %v2854_v6, %v1597_v50 }
 0x6b1   :  { %v1618_v53 = vmax.f32 %v1598_v51, 0.0 }
 0x6b3   :  { %v2805_v54 = vpack.c.bf16 %v1618_v53, %v1617_v52 }
 0x6b5   :  { %2831 = vst [vmem:[#allocation2 + $0x30] sm:$0xff] %v2805_v54  }
 0x6b6   :  { %v1600_v55 = vpop.f32.mrf.mxu0 }
 0x6b7   :  { %v1601_v56 = vadd.f32 %v2854_v6, %v1600_v55 }
 0x6b9   :  { %v1619_v60 = vmax.f32 %v1601_v56, 0.0 }
 0x6bc   :  { %v2666_v1 = vld [vmem:[#allocation2 + $0x30] sm:$0xff] }
 0x6be   :  { %v1602_v57 = vpop.f32.mrf.mxu0 }
 0x6bf   :  { %v1603_v58 = vadd.f32 %v2854_v6, %v1602_v57  ;;  %v2671_v6 = vld [vmem:[%s3279_s7 + $0x18] sm:$0xff] }
 0x6c0   :  { %1804 = vmatpush.bf16.msrb.mxu2 %v2671_v6 }
 0x6c1   :  { %v1620_v61 = vmax.f32 %v1603_v58, 0.0 }
 0x6c3   :  { %v2810_v62 = vpack.c.bf16 %v1620_v61, %v1619_v60 }
 0x6c4   :  { %1805 = vmatpush.bf16.msrb.mxu2 %v2670_v8 }
 0x6c5   :  { %2832 = vst [vmem:[#allocation2 + $0x38] sm:$0xff] %v2810_v62  }
 0x6c8   :  { %1806 = vmatpush.bf16.msrb.mxu2 %v2669_v10 }
 0x6cc   :  { %v2667_v59 = vld [vmem:[#allocation2 + $0x38] sm:$0xff]  ;;  %1807 = vmatpush.bf16.msrb.mxu2 %v2668_v12 }
 0x6cd   :  { %1718 = vmatpush.bf16.msra.mxu1 %v2667_v59 }
 0x6d1   :  { %1719 = vmatpush.bf16.msra.mxu1 %v2666_v1 }
 0x6d5   :  { %1720 = vmatpush.bf16.msra.mxu1 %v2665_v3 }
 0x6d9   :  { %1721 = vmatpush.bf16.msra.mxu1 %v2664_v5 }
 0x6dd   :  { %1722 = vmatpush.bf16.msra.mxu1 %v2663_v7 }
 0x6e1   :  { %1723 = vmatpush.bf16.msra.mxu1 %v2662_v9 }
 0x6e5   :  { %1724 = vmatpush.bf16.msra.mxu1 %v2661_v11 }
 0x6e9   :  { %1725 = vmatpush.bf16.msra.mxu1 %v2660_v14 }
 0x6ec   :  { %1726 = vmatmul.bf16.vlgmr.msra.gmra.mxu1 %v1653_v15 }
 0x6ed   :  { %1966 = vmatpush.bf16.msrb.mxu1 %v2691_v26 }
 0x6f1   :  { %1967 = vmatpush.bf16.msrb.mxu1 %v2690_v27 }
 0x6f5   :  { %1968 = vmatpush.bf16.msrb.mxu1 %v2689_v28 }
 0x6f9   :  { %1969 = vmatpush.bf16.msrb.mxu1 %v2688_v29 }
 0x6fd   :  { %1970 = vmatpush.bf16.msrb.mxu1 %v2687_v30 }
 0x701   :  { %1971 = vmatpush.bf16.msrb.mxu1 %v2686_v31 }
 0x705   :  { %1972 = vmatpush.bf16.msrb.mxu1 %v2685_v38 }
 0x709   :  { %1973 = vmatpush.bf16.msrb.mxu1 %v2684_v39 }
 0x769   :  { %v1727_v22 = vpop.f32.mrf.mxu1 }
 0x76a   :  { %v1731_v23 = vpack.c.bf16 %v1727_v22, %v1727_v22 }
 0x76c   :  { %1808 = vmatmul.bf16.vlgmr.msrb.gmra.mxu2 %v1731_v23 }
 0x771   :  { %v1729_v25 = vpop.f32.mrf.mxu1 }
 0x7ef   :  { %v1809_v33 = vpop.f32.mrf.mxu2 }
 0x7f0   :  { %v1810_v34 = vadd.f32 %v2855_v32, %v1809_v33 }
 0x7f2   :  { %v1813_v35 = vmax.f32 %v1810_v34, 0.0 }
 0x7f4   :  { %v1814_v36 = vpack.c.bf16 %v1813_v35, %v1813_v35 }
 0x7f6   :  { %1891 = vmatmul.bf16.vlgmr.msrb.gmra.mxu3 %v1814_v36 }
 0x7f7   :  { %v1811_v37 = vpop.f32.mrf.mxu2 }
 0x879   :  { %v1892_v42 = vpop.f32.mrf.mxu3 }
 0x87a   :  { %v1893_v43 = vadd.f32 %v2856_v40, %v1892_v42 }
 0x87c   :  { %v1896_v44 = vmax.f32 %v1893_v43, 0.0 }
 0x87e   :  { %v1897_v41 = vpack.c.bf16 %v1896_v44, %v1896_v44 }
 0x880   :  { %1974 = vmatmul.bf16.vlgmr.msrb.gmra.mxu1 %v1897_v41 }
 0x881   :  { %v1894_v45 = vpop.f32.mrf.mxu3 }
 0x8fd   :  { %v1975_v47 = vpop.f32.mrf.mxu1 }
 0x8fe   :  { %v1976_v48 = vadd.f32 %v2857_v46, %v1975_v47 }
 0x900   :  { %1979 = vst [vmem:[%s3286_s13] sm:$0xff] %v1976_v48 }
 0x905   :  { %v1977_v49 = vpop.f32.mrf.mxu1 }

</bundles_post_ra>
